<compile_context>
chip_gen: v7x
topology: tpu7x:2x2x1
jax: 0.10.0
libtpu: 0.0.40
codegen_flags: <defaults>
</compile_context>

<pallas_src>
import jax
import jax.numpy as jnp
import numpy as np
from jax.experimental import pallas as pl
from jax.experimental.pallas import tpu as pltpu

T = 8          # sequence length
B = 2          # batch
D_IN = 300     # N_text_in
H = 128        # N_text_out
M = 5          # N_metrics
MP = 8         # metrics padded to 8 lanes (sublane-aligned W1 slab slice)
H1 = 512       # MLP hidden width
NCLS = 2       # output classes


def classifier_kernel(x_ref, met_ref, wih_ref, whh_ref, bias_ref, w3d_ref,
                      w1_hbm, w2_hbm, out_ref,
                      w1_vmem, w2_vmem, dma_sem):
    bf16 = jnp.bfloat16
    f32 = jnp.float32

    # ---- kick off the MLP weight DMAs; they overlap the serial recurrence ----
    w1_cp = pltpu.make_async_copy(w1_hbm, w1_vmem, dma_sem.at[0])
    w2_cp = pltpu.make_async_copy(w2_hbm, w2_vmem, dma_sem.at[1])
    w1_cp.start()
    w2_cp.start()

    # ---- unpack the packed f32 bias slab ----
    b_rnn = bias_ref[0:1, 0:H]        # b_ih + b_hh            (1, H)
    b1 = bias_ref[1:2, :]             # Linear1 bias           (1, H1)
    b2 = bias_ref[2:3, :]             # Linear2 bias           (1, H1)
    b3d = bias_ref[3:4, 0:1]          # b3[1] - b3[0]          (1, 1)

    # ---- hoisted input projection for all T steps in one MXU push ----
    xw = (jnp.dot(x_ref[...].astype(bf16), wih_ref[...],
                  preferred_element_type=f32)
          + b_rnn)                                            # (T*B, H) f32

    # ---- serial tanh recurrence; h_0 == 0 so the t=0 matmul is skipped ----
    h = jnp.tanh(xw[0:B, :])
    for t in range(1, T):                                     # fully unrolled
        hh = jnp.dot(h.astype(bf16), whh_ref[...], preferred_element_type=f32)
        h = jnp.tanh(xw[t * B:(t + 1) * B, :] + hh)

    # ---- MLP layer 1: cat(h, metrics) @ W1 via split slab rows ----
    w1_cp.wait()
    a1 = (jnp.dot(h.astype(bf16), w1_vmem[0:H, :], preferred_element_type=f32)
          + jnp.dot(met_ref[...].astype(bf16), w1_vmem[H:H + MP, :],
                    preferred_element_type=f32)
          + b1)
    a1 = jnp.maximum(a1, 0.0)

    # ---- MLP layer 2 ----
    w2_cp.wait()
    a2 = jnp.dot(a1.astype(bf16), w2_vmem[...], preferred_element_type=f32) + b2
    a2 = jnp.maximum(a2, 0.0)

    # ---- 2-class softmax == sigmoid of logit difference (VPU + lane reduce) ----
    d = jnp.sum(a2 * w3d_ref[...], axis=-1, keepdims=True) + b3d     # (B, 1)
    p1 = 1.0 / (1.0 + jnp.exp(-d))
    col = jax.lax.broadcasted_iota(jnp.int32, (B, NCLS), 1)
    out_ref[...] = jnp.where(col == 1, p1, 1.0 - p1).astype(out_ref.dtype)


def classifier_forward(x, metrics, params):
    (w_ih, w_hh, b_rnn, w1h, w1m, b1, w2, b2, w3, b3) = params
    T_, B_, _ = x.shape

    # ---- wrapper-side layout plumbing (no in-kernel reshapes / concats) ----
    x2d = x.reshape(T_ * B_, D_IN)
    met_pad = jnp.zeros((B_, MP), jnp.float32).at[:, :M].set(metrics)

    # W1 slab: rows [0:H] = hidden part, rows [H:H+M] = metrics part, rest zero.
    w1_slab = jnp.zeros((H + MP, H1), jnp.bfloat16)
    w1_slab = w1_slab.at[:H, :].set(w1h)
    w1_slab = w1_slab.at[H:H + M, :].set(w1m)

    # folded 2-class head (difference taken in f32) and packed bias slab
    w3_f32 = w3.astype(jnp.float32)
    w3d = (w3_f32[:, 1] - w3_f32[:, 0]).reshape(1, H1)              # (1, H1) f32
    bias_slab = jnp.zeros((8, H1), jnp.float32)
    bias_slab = bias_slab.at[0, :H].set(b_rnn[0])
    bias_slab = bias_slab.at[1, :].set(b1[0])
    bias_slab = bias_slab.at[2, :].set(b2[0])
    bias_slab = bias_slab.at[3, 0].set(b3[0, 1] - b3[0, 0])

    def full(shape):
        # whole-array block (all dims equal the full extent)
        return pl.BlockSpec(shape, lambda i: tuple(0 for _ in shape))

    grid_spec = pltpu.PrefetchScalarGridSpec(
        num_scalar_prefetch=0,
        grid=(1,),                        # single invocation; loop lives in-kernel
        in_specs=[
            full((T_ * B_, D_IN)),                   # x flattened (T*B, D_IN)
            full((B_, MP)),                          # metrics zero-padded to 8
            full((D_IN, H)),                         # W_ih^T (bf16)
            full((H, H)),                            # W_hh^T (bf16)
            full((8, H1)),                           # packed f32 bias slab
            full((1, H1)),                           # w3[:,1]-w3[:,0] (f32)
            pl.BlockSpec(memory_space=pl.ANY),       # W1 slab (bf16, manual DMA)
            pl.BlockSpec(memory_space=pl.ANY),       # W2^T    (bf16, manual DMA)
        ],
        out_specs=pl.BlockSpec((B_, NCLS), lambda i: (0, 0)),
        scratch_shapes=[
            pltpu.VMEM((H + MP, H1), jnp.bfloat16),  # W1 slab landing buffer
            pltpu.VMEM((H1, H1), jnp.bfloat16),      # W2 landing buffer
            pltpu.SemaphoreType.DMA((2,)),
        ],
    )
    # TODO(synk): if many independent sequences are available, fold them into B
    # (MXU is <1% utilized at B=2) and/or add a "parallel" grid axis so v7x's
    # second TensorCore is used.
    return pl.pallas_call(
        classifier_kernel,
        out_shape=jax.ShapeDtypeStruct((B_, NCLS), jnp.float32),
        grid_spec=grid_spec,
        compiler_params=pltpu.CompilerParams(
            dimension_semantics=("arbitrary",)),
    )(x2d, met_pad, w_ih, w_hh, bias_slab, w3d, w1_slab, w2)


def reference_forward(x, metrics, params):
    """Pure-JAX f32 reference mirroring the PyTorch forward (full softmax)."""
    w_ih, w_hh, b_rnn, w1h, w1m, b1, w2, b2, w3, b3 = [
        jnp.asarray(p, jnp.float32) for p in params]

    def step(h, x_t):
        return jnp.tanh(x_t @ w_ih + h @ w_hh + b_rnn), None

    h0 = jnp.zeros((x.shape[1], H), jnp.float32)
    h_T, _ = jax.lax.scan(step, h0, x)
    a1 = jax.nn.relu(h_T @ w1h + metrics @ w1m + b1)
    a2 = jax.nn.relu(a1 @ w2 + b2)
    logits = a2 @ w3 + b3
    return jax.nn.softmax(logits, axis=1)


def init_params(key):
    ks = jax.random.split(key, 11)
    u = lambda k, shape, bound: jax.random.uniform(
        k, shape, jnp.float32, minval=-bound, maxval=bound)
    bf = lambda w: w.astype(jnp.bfloat16)     # weight matrices stored in bf16
    # nn.RNN init: U(-1/sqrt(H), 1/sqrt(H)); stored transposed -> (in, out)
    rb = 1.0 / np.sqrt(H)
    w_ih = bf(u(ks[0], (D_IN, H), rb))
    w_hh = bf(u(ks[1], (H, H), rb))
    b_rnn = u(ks[2], (1, H), rb) + u(ks[3], (1, H), rb)   # b_ih + b_hh folded (f32)
    # Linear(H+M, 512): U(-1/sqrt(in), 1/sqrt(in)); W1 split into h / metrics rows
    b1v = 1.0 / np.sqrt(H + M)
    w1h = bf(u(ks[4], (H, H1), b1v))
    w1m = bf(u(ks[5], (M, H1), b1v))
    b1 = u(ks[6], (1, H1), b1v)
    b2v = 1.0 / np.sqrt(H1)
    w2 = bf(u(ks[7], (H1, H1), b2v))
    b2 = u(ks[8], (1, H1), b2v)
    w3 = bf(u(ks[9], (H1, NCLS), b2v))
    b3 = u(ks[10], (1, NCLS), b2v)
    return (w_ih, w_hh, b_rnn, w1h, w1m, b1, w2, b2, w3, b3)


if __name__ == "__main__":
    key = jax.random.PRNGKey(0)
    kp, kx, km = jax.random.split(key, 3)
    params = init_params(kp)
    x = jax.random.normal(kx, (T, B, D_IN), jnp.float32)       # (seq, batch, feat)
    metrics_in = jax.random.normal(km, (B, M), jnp.float32)    # (batch, 5 metrics)

    out = classifier_forward(x, metrics_in, params)
    out = jax.block_until_ready(out)

    ref = reference_forward(x, metrics_in, params)
    np.testing.assert_allclose(np.asarray(out), np.asarray(ref), rtol=2e-2, atol=2e-2)
    assert out.shape == (B, NCLS)
    print("KERNEL_OK")
</pallas_src>

<mosaic_0001>
module attributes {stable_mosaic.version = 11 : i64} {
  func.func @classifier_kernel(%arg0: i32, %arg1: memref<16x300xf32, #tpu.memory_space<vmem>>, %arg2: memref<2x8xf32, #tpu.memory_space<vmem>>, %arg3: memref<300x128xbf16, #tpu.memory_space<vmem>>, %arg4: memref<128x128xbf16, #tpu.memory_space<vmem>>, %arg5: memref<8x512xf32, #tpu.memory_space<vmem>>, %arg6: memref<1x512xf32, #tpu.memory_space<vmem>>, %arg7: memref<136x512xbf16, #tpu.memory_space<any>>, %arg8: memref<512x512xbf16, #tpu.memory_space<any>>, %arg9: memref<2x2xf32, #tpu.memory_space<vmem>>, %arg10: memref<136x512xbf16, #tpu.memory_space<vmem>>, %arg11: memref<512x512xbf16, #tpu.memory_space<vmem>>, %arg12: memref<2x!tpu.dma_semaphore, #tpu.memory_space<semaphore_mem>>) attributes {dimension_semantics = [#tpu.dimension_semantics<arbitrary>], iteration_bounds = array<i64: 1>, scalar_prefetch = 0 : i64, scratch_operands = 3 : i64, tpu.core_type = #tpu.core_type<tc>, window_params = [{pipeline_mode = #tpu.pipeline_mode<synchronous>, transform_indices = @transform_0, window_bounds = array<i64: 16, 300>}, {pipeline_mode = #tpu.pipeline_mode<synchronous>, transform_indices = @transform_1, window_bounds = array<i64: 2, 8>}, {pipeline_mode = #tpu.pipeline_mode<synchronous>, transform_indices = @transform_2, window_bounds = array<i64: 300, 128>}, {pipeline_mode = #tpu.pipeline_mode<synchronous>, transform_indices = @transform_3, window_bounds = array<i64: 128, 128>}, {pipeline_mode = #tpu.pipeline_mode<synchronous>, transform_indices = @transform_4, window_bounds = array<i64: 8, 512>}, {pipeline_mode = #tpu.pipeline_mode<synchronous>, transform_indices = @transform_5, window_bounds = array<i64: 1, 512>}, {}, {}, {pipeline_mode = #tpu.pipeline_mode<synchronous>, transform_indices = @transform_8, window_bounds = array<i64: 2, 2>}]} {
    %c0_i32 = arith.constant 0 : i32
    %0 = tpu.memref_slice %arg12[%c0_i32] : memref<2x!tpu.dma_semaphore, #tpu.memory_space<semaphore_mem>> -> memref<1x!tpu.dma_semaphore, #tpu.memory_space<semaphore_mem>>
    %1 = tpu.memref_squeeze %0 : memref<1x!tpu.dma_semaphore, #tpu.memory_space<semaphore_mem>> -> memref<!tpu.dma_semaphore, #tpu.memory_space<semaphore_mem>>
    tpu.enqueue_dma source(%arg7 : memref<136x512xbf16, #tpu.memory_space<any>>) target(%arg10 : memref<136x512xbf16, #tpu.memory_space<vmem>>) target_semaphore(%1 : memref<!tpu.dma_semaphore, #tpu.memory_space<semaphore_mem>>)
    %c1_i32 = arith.constant 1 : i32
    %2 = tpu.memref_slice %arg12[%c1_i32] : memref<2x!tpu.dma_semaphore, #tpu.memory_space<semaphore_mem>> -> memref<1x!tpu.dma_semaphore, #tpu.memory_space<semaphore_mem>>
    %3 = tpu.memref_squeeze %2 : memref<1x!tpu.dma_semaphore, #tpu.memory_space<semaphore_mem>> -> memref<!tpu.dma_semaphore, #tpu.memory_space<semaphore_mem>>
    tpu.enqueue_dma source(%arg8 : memref<512x512xbf16, #tpu.memory_space<any>>) target(%arg11 : memref<512x512xbf16, #tpu.memory_space<vmem>>) target_semaphore(%3 : memref<!tpu.dma_semaphore, #tpu.memory_space<semaphore_mem>>)
    %c0 = arith.constant 0 : index
    %c0_0 = arith.constant 0 : index
    %4 = vector.load %arg5[%c0, %c0_0] : memref<8x512xf32, #tpu.memory_space<vmem>>, vector<1x128xf32>
    %c1 = arith.constant 1 : index
    %c0_1 = arith.constant 0 : index
    %5 = vector.load %arg5[%c1, %c0_1] : memref<8x512xf32, #tpu.memory_space<vmem>>, vector<1x512xf32>
    %c2 = arith.constant 2 : index
    %c0_2 = arith.constant 0 : index
    %6 = vector.load %arg5[%c2, %c0_2] : memref<8x512xf32, #tpu.memory_space<vmem>>, vector<1x512xf32>
    %c3 = arith.constant 3 : index
    %c0_3 = arith.constant 0 : index
    %7 = vector.load %arg5[%c3, %c0_3] : memref<8x512xf32, #tpu.memory_space<vmem>>, vector<1x1xf32>
    %c0_4 = arith.constant 0 : index
    %c0_5 = arith.constant 0 : index
    %8 = vector.load %arg1[%c0_4, %c0_5] : memref<16x300xf32, #tpu.memory_space<vmem>>, vector<16x300xf32>
    %9 = arith.truncf %8 : vector<16x300xf32> to vector<16x300xbf16>
    %c0_6 = arith.constant 0 : index
    %c0_7 = arith.constant 0 : index
    %10 = vector.load %arg3[%c0_6, %c0_7] : memref<300x128xbf16, #tpu.memory_space<vmem>>, vector<300x128xbf16>
    %cst = arith.constant dense<0.000000e+00> : vector<16x128xf32>
    %11 = tpu.matmul %9, %10, %cst {dimension_numbers = #tpu.dot_dimension_numbers<[1], [0], [0], [1], [0, 0, 1, 1], [], []>} : vector<16x300xbf16>, vector<300x128xbf16>, vector<16x128xf32> -> vector<16x128xf32>
    %12 = vector.broadcast %4 : vector<1x128xf32> to vector<16x128xf32>
    %13 = arith.addf %11, %12 : vector<16x128xf32>
    %14 = vector.extract_strided_slice %13 {offsets = [0, 0], sizes = [2, 128], strides = [1, 1]} : vector<16x128xf32> to vector<2x128xf32>
    %15 = math.tanh %14 : vector<2x128xf32>
    %16 = arith.truncf %15 : vector<2x128xf32> to vector<2x128xbf16>
    %c0_8 = arith.constant 0 : index
    %c0_9 = arith.constant 0 : index
    %17 = vector.load %arg4[%c0_8, %c0_9] : memref<128x128xbf16, #tpu.memory_space<vmem>>, vector<128x128xbf16>
    %cst_10 = arith.constant dense<0.000000e+00> : vector<2x128xf32>
    %18 = tpu.matmul %16, %17, %cst_10 {dimension_numbers = #tpu.dot_dimension_numbers<[1], [0], [0], [1], [0, 0, 1, 1], [], []>} : vector<2x128xbf16>, vector<128x128xbf16>, vector<2x128xf32> -> vector<2x128xf32>
    %19 = vector.extract_strided_slice %13 {offsets = [2, 0], sizes = [2, 128], strides = [1, 1]} : vector<16x128xf32> to vector<2x128xf32>
    %20 = arith.addf %19, %18 : vector<2x128xf32>
    %21 = math.tanh %20 : vector<2x128xf32>
    %22 = arith.truncf %21 : vector<2x128xf32> to vector<2x128xbf16>
    %c0_11 = arith.constant 0 : index
    %c0_12 = arith.constant 0 : index
    %23 = vector.load %arg4[%c0_11, %c0_12] : memref<128x128xbf16, #tpu.memory_space<vmem>>, vector<128x128xbf16>
    %cst_13 = arith.constant dense<0.000000e+00> : vector<2x128xf32>
    %24 = tpu.matmul %22, %23, %cst_13 {dimension_numbers = #tpu.dot_dimension_numbers<[1], [0], [0], [1], [0, 0, 1, 1], [], []>} : vector<2x128xbf16>, vector<128x128xbf16>, vector<2x128xf32> -> vector<2x128xf32>
    %25 = vector.extract_strided_slice %13 {offsets = [4, 0], sizes = [2, 128], strides = [1, 1]} : vector<16x128xf32> to vector<2x128xf32>
    %26 = arith.addf %25, %24 : vector<2x128xf32>
    %27 = math.tanh %26 : vector<2x128xf32>
    %28 = arith.truncf %27 : vector<2x128xf32> to vector<2x128xbf16>
    %c0_14 = arith.constant 0 : index
    %c0_15 = arith.constant 0 : index
    %29 = vector.load %arg4[%c0_14, %c0_15] : memref<128x128xbf16, #tpu.memory_space<vmem>>, vector<128x128xbf16>
    %cst_16 = arith.constant dense<0.000000e+00> : vector<2x128xf32>
    %30 = tpu.matmul %28, %29, %cst_16 {dimension_numbers = #tpu.dot_dimension_numbers<[1], [0], [0], [1], [0, 0, 1, 1], [], []>} : vector<2x128xbf16>, vector<128x128xbf16>, vector<2x128xf32> -> vector<2x128xf32>
    %31 = vector.extract_strided_slice %13 {offsets = [6, 0], sizes = [2, 128], strides = [1, 1]} : vector<16x128xf32> to vector<2x128xf32>
    %32 = arith.addf %31, %30 : vector<2x128xf32>
    %33 = math.tanh %32 : vector<2x128xf32>
    %34 = arith.truncf %33 : vector<2x128xf32> to vector<2x128xbf16>
    %c0_17 = arith.constant 0 : index
    %c0_18 = arith.constant 0 : index
    %35 = vector.load %arg4[%c0_17, %c0_18] : memref<128x128xbf16, #tpu.memory_space<vmem>>, vector<128x128xbf16>
    %cst_19 = arith.constant dense<0.000000e+00> : vector<2x128xf32>
    %36 = tpu.matmul %34, %35, %cst_19 {dimension_numbers = #tpu.dot_dimension_numbers<[1], [0], [0], [1], [0, 0, 1, 1], [], []>} : vector<2x128xbf16>, vector<128x128xbf16>, vector<2x128xf32> -> vector<2x128xf32>
    %37 = vector.extract_strided_slice %13 {offsets = [8, 0], sizes = [2, 128], strides = [1, 1]} : vector<16x128xf32> to vector<2x128xf32>
    %38 = arith.addf %37, %36 : vector<2x128xf32>
    %39 = math.tanh %38 : vector<2x128xf32>
    %40 = arith.truncf %39 : vector<2x128xf32> to vector<2x128xbf16>
    %c0_20 = arith.constant 0 : index
    %c0_21 = arith.constant 0 : index
    %41 = vector.load %arg4[%c0_20, %c0_21] : memref<128x128xbf16, #tpu.memory_space<vmem>>, vector<128x128xbf16>
    %cst_22 = arith.constant dense<0.000000e+00> : vector<2x128xf32>
    %42 = tpu.matmul %40, %41, %cst_22 {dimension_numbers = #tpu.dot_dimension_numbers<[1], [0], [0], [1], [0, 0, 1, 1], [], []>} : vector<2x128xbf16>, vector<128x128xbf16>, vector<2x128xf32> -> vector<2x128xf32>
    %43 = vector.extract_strided_slice %13 {offsets = [10, 0], sizes = [2, 128], strides = [1, 1]} : vector<16x128xf32> to vector<2x128xf32>
    %44 = arith.addf %43, %42 : vector<2x128xf32>
    %45 = math.tanh %44 : vector<2x128xf32>
    %46 = arith.truncf %45 : vector<2x128xf32> to vector<2x128xbf16>
    %c0_23 = arith.constant 0 : index
    %c0_24 = arith.constant 0 : index
    %47 = vector.load %arg4[%c0_23, %c0_24] : memref<128x128xbf16, #tpu.memory_space<vmem>>, vector<128x128xbf16>
    %cst_25 = arith.constant dense<0.000000e+00> : vector<2x128xf32>
    %48 = tpu.matmul %46, %47, %cst_25 {dimension_numbers = #tpu.dot_dimension_numbers<[1], [0], [0], [1], [0, 0, 1, 1], [], []>} : vector<2x128xbf16>, vector<128x128xbf16>, vector<2x128xf32> -> vector<2x128xf32>
    %49 = vector.extract_strided_slice %13 {offsets = [12, 0], sizes = [2, 128], strides = [1, 1]} : vector<16x128xf32> to vector<2x128xf32>
    %50 = arith.addf %49, %48 : vector<2x128xf32>
    %51 = math.tanh %50 : vector<2x128xf32>
    %52 = arith.truncf %51 : vector<2x128xf32> to vector<2x128xbf16>
    %c0_26 = arith.constant 0 : index
    %c0_27 = arith.constant 0 : index
    %53 = vector.load %arg4[%c0_26, %c0_27] : memref<128x128xbf16, #tpu.memory_space<vmem>>, vector<128x128xbf16>
    %cst_28 = arith.constant dense<0.000000e+00> : vector<2x128xf32>
    %54 = tpu.matmul %52, %53, %cst_28 {dimension_numbers = #tpu.dot_dimension_numbers<[1], [0], [0], [1], [0, 0, 1, 1], [], []>} : vector<2x128xbf16>, vector<128x128xbf16>, vector<2x128xf32> -> vector<2x128xf32>
    %55 = vector.extract_strided_slice %13 {offsets = [14, 0], sizes = [2, 128], strides = [1, 1]} : vector<16x128xf32> to vector<2x128xf32>
    %56 = arith.addf %55, %54 : vector<2x128xf32>
    %57 = math.tanh %56 : vector<2x128xf32>
    %c0_i32_29 = arith.constant 0 : i32
    %58 = tpu.memref_slice %arg12[%c0_i32_29] : memref<2x!tpu.dma_semaphore, #tpu.memory_space<semaphore_mem>> -> memref<1x!tpu.dma_semaphore, #tpu.memory_space<semaphore_mem>>
    %59 = tpu.memref_squeeze %58 : memref<1x!tpu.dma_semaphore, #tpu.memory_space<semaphore_mem>> -> memref<!tpu.dma_semaphore, #tpu.memory_space<semaphore_mem>>
    tpu.wait_dma2 semaphore(%59 : memref<!tpu.dma_semaphore, #tpu.memory_space<semaphore_mem>>) src(%arg7 : memref<136x512xbf16, #tpu.memory_space<any>>) dst(%arg10 : memref<136x512xbf16, #tpu.memory_space<vmem>>)
    %60 = arith.truncf %57 : vector<2x128xf32> to vector<2x128xbf16>
    %c0_30 = arith.constant 0 : index
    %c0_31 = arith.constant 0 : index
    %61 = vector.load %arg10[%c0_30, %c0_31] : memref<136x512xbf16, #tpu.memory_space<vmem>>, vector<128x512xbf16>
    %cst_32 = arith.constant dense<0.000000e+00> : vector<2x512xf32>
    %62 = tpu.matmul %60, %61, %cst_32 {dimension_numbers = #tpu.dot_dimension_numbers<[1], [0], [0], [1], [0, 0, 1, 1], [], []>} : vector<2x128xbf16>, vector<128x512xbf16>, vector<2x512xf32> -> vector<2x512xf32>
    %c0_33 = arith.constant 0 : index
    %c0_34 = arith.constant 0 : index
    %63 = vector.load %arg2[%c0_33, %c0_34] : memref<2x8xf32, #tpu.memory_space<vmem>>, vector<2x8xf32>
    %64 = arith.truncf %63 : vector<2x8xf32> to vector<2x8xbf16>
    %c128 = arith.constant 128 : index
    %c0_35 = arith.constant 0 : index
    %65 = vector.load %arg10[%c128, %c0_35] : memref<136x512xbf16, #tpu.memory_space<vmem>>, vector<8x512xbf16>
    %cst_36 = arith.constant dense<0.000000e+00> : vector<2x512xf32>
    %66 = tpu.matmul %64, %65, %cst_36 {dimension_numbers = #tpu.dot_dimension_numbers<[1], [0], [0], [1], [0, 0, 1, 1], [], []>} : vector<2x8xbf16>, vector<8x512xbf16>, vector<2x512xf32> -> vector<2x512xf32>
    %67 = arith.addf %62, %66 : vector<2x512xf32>
    %68 = vector.broadcast %5 : vector<1x512xf32> to vector<2x512xf32>
    %69 = arith.addf %67, %68 : vector<2x512xf32>
    %cst_37 = arith.constant 0.000000e+00 : f32
    %70 = vector.broadcast %cst_37 : f32 to vector<2x512xf32>
    %71 = arith.maximumf %69, %70 : vector<2x512xf32>
    %c1_i32_38 = arith.constant 1 : i32
    %72 = tpu.memref_slice %arg12[%c1_i32_38] : memref<2x!tpu.dma_semaphore, #tpu.memory_space<semaphore_mem>> -> memref<1x!tpu.dma_semaphore, #tpu.memory_space<semaphore_mem>>
    %73 = tpu.memref_squeeze %72 : memref<1x!tpu.dma_semaphore, #tpu.memory_space<semaphore_mem>> -> memref<!tpu.dma_semaphore, #tpu.memory_space<semaphore_mem>>
    tpu.wait_dma2 semaphore(%73 : memref<!tpu.dma_semaphore, #tpu.memory_space<semaphore_mem>>) src(%arg8 : memref<512x512xbf16, #tpu.memory_space<any>>) dst(%arg11 : memref<512x512xbf16, #tpu.memory_space<vmem>>)
    %74 = arith.truncf %71 : vector<2x512xf32> to vector<2x512xbf16>
    %c0_39 = arith.constant 0 : index
    %c0_40 = arith.constant 0 : index
    %75 = vector.load %arg11[%c0_39, %c0_40] : memref<512x512xbf16, #tpu.memory_space<vmem>>, vector<512x512xbf16>
    %cst_41 = arith.constant dense<0.000000e+00> : vector<2x512xf32>
    %76 = tpu.matmul %74, %75, %cst_41 {dimension_numbers = #tpu.dot_dimension_numbers<[1], [0], [0], [1], [0, 0, 1, 1], [], []>} : vector<2x512xbf16>, vector<512x512xbf16>, vector<2x512xf32> -> vector<2x512xf32>
    %77 = vector.broadcast %6 : vector<1x512xf32> to vector<2x512xf32>
    %78 = arith.addf %76, %77 : vector<2x512xf32>
    %cst_42 = arith.constant 0.000000e+00 : f32
    %79 = vector.broadcast %cst_42 : f32 to vector<2x512xf32>
    %80 = arith.maximumf %78, %79 : vector<2x512xf32>
    %c0_43 = arith.constant 0 : index
    %c0_44 = arith.constant 0 : index
    %81 = vector.load %arg6[%c0_43, %c0_44] : memref<1x512xf32, #tpu.memory_space<vmem>>, vector<1x512xf32>
    %82 = vector.broadcast %81 : vector<1x512xf32> to vector<2x512xf32>
    %83 = arith.mulf %80, %82 : vector<2x512xf32>
    %cst_45 = arith.constant dense<0.000000e+00> : vector<2xf32>
    %84 = vector.multi_reduction <add>, %83, %cst_45 [1] : vector<2x512xf32> to vector<2xf32>
    %85 = vector.shape_cast %84 : vector<2xf32> to vector<2x1xf32>
    %86 = vector.broadcast %7 : vector<1x1xf32> to vector<2x1xf32>
    %87 = arith.addf %85, %86 : vector<2x1xf32>
    %cst_46 = arith.constant 0.000000e+00 : f32
    %88 = vector.broadcast %cst_46 : f32 to vector<2x1xf32>
    %89 = arith.subf %88, %87 : vector<2x1xf32>
    %90 = math.exp %89 : vector<2x1xf32>
    %cst_47 = arith.constant 1.000000e+00 : f32
    %91 = vector.broadcast %cst_47 : f32 to vector<2x1xf32>
    %92 = arith.addf %91, %90 : vector<2x1xf32>
    %cst_48 = arith.constant 1.000000e+00 : f32
    %93 = vector.broadcast %cst_48 : f32 to vector<2x1xf32>
    %94 = arith.divf %93, %92 : vector<2x1xf32>
    %95 = tpu.iota {dimensions = array<i32: 1>} : vector<2x2xi32>
    %c1_i32_49 = arith.constant 1 : i32
    %96 = vector.broadcast %c1_i32_49 : i32 to vector<2x2xi32>
    %97 = arith.cmpi eq, %95, %96 : vector<2x2xi32>
    %cst_50 = arith.constant 1.000000e+00 : f32
    %98 = vector.broadcast %cst_50 : f32 to vector<2x1xf32>
    %99 = arith.subf %98, %94 : vector<2x1xf32>
    %100 = vector.shape_cast %94 : vector<2x1xf32> to vector<2x1xf32>
    %101 = vector.broadcast %100 : vector<2x1xf32> to vector<2x2xf32>
    %102 = vector.shape_cast %99 : vector<2x1xf32> to vector<2x1xf32>
    %103 = vector.broadcast %102 : vector<2x1xf32> to vector<2x2xf32>
    %104 = arith.select %97, %101, %103 : vector<2x2xi1>, vector<2x2xf32>
    %c0_51 = arith.constant 0 : index
    %c0_52 = arith.constant 0 : index
    %105 = vector.load %arg9[%c0_51, %c0_52] : memref<2x2xf32, #tpu.memory_space<vmem>>, vector<2x2xf32>
    tpu.vector_store %arg9[%c0_51, %c0_52], %104 {strides = array<i32>} : memref<2x2xf32, #tpu.memory_space<vmem>>, vector<2x2xf32>,
    return
  }
  func.func @transform_0(%arg0: i32) -> (i32, i32) {
    %c0_i32 = arith.constant 0 : i32
    %c0_i32_0 = arith.constant 0 : i32
    %c0_i32_1 = arith.constant 0 : i32
    return %c0_i32, %c0_i32_0 : i32, i32
  }
  func.func @transform_1(%arg0: i32) -> (i32, i32) {
    %c0_i32 = arith.constant 0 : i32
    %c0_i32_0 = arith.constant 0 : i32
    %c0_i32_1 = arith.constant 0 : i32
    return %c0_i32, %c0_i32_0 : i32, i32
  }
  func.func @transform_2(%arg0: i32) -> (i32, i32) {
    %c0_i32 = arith.constant 0 : i32
    %c0_i32_0 = arith.constant 0 : i32
    %c0_i32_1 = arith.constant 0 : i32
    return %c0_i32, %c0_i32_0 : i32, i32
  }
  func.func @transform_3(%arg0: i32) -> (i32, i32) {
    %c0_i32 = arith.constant 0 : i32
    %c0_i32_0 = arith.constant 0 : i32
    %c0_i32_1 = arith.constant 0 : i32
    return %c0_i32, %c0_i32_0 : i32, i32
  }
  func.func @transform_4(%arg0: i32) -> (i32, i32) {
    %c0_i32 = arith.constant 0 : i32
    %c0_i32_0 = arith.constant 0 : i32
    %c0_i32_1 = arith.constant 0 : i32
    return %c0_i32, %c0_i32_0 : i32, i32
  }
  func.func @transform_5(%arg0: i32) -> (i32, i32) {
    %c0_i32 = arith.constant 0 : i32
    %c0_i32_0 = arith.constant 0 : i32
    %c0_i32_1 = arith.constant 0 : i32
    return %c0_i32, %c0_i32_0 : i32, i32
  }
  func.func @transform_8(%arg0: i32) -> (i32, i32) {
    %c0_i32 = arith.constant 0 : i32
    %c0_i32_0 = arith.constant 0 : i32
    %c0_i32_1 = arith.constant 0 : i32
    return %c0_i32, %c0_i32_0 : i32, i32
  }
}

</mosaic_0001>

<bundles_post_ra>
// kernel: tpu_custom_call.1
= control target key start
LH: loop header
LB: loop body
LE: loop exit
PB: predicated region body
PF: predicated region fallthrough
CT: control target
= control target key end

     0   :  { %13 = vsyncpa [#allocation6], 0  ;;  %s2595_s0 = inlined_call_operand.hbm [shape: f32[16,300], index: 0, kind: input, shape index: {}]   ;;  %s2596_s1 = inlined_call_operand.vmem [shape: f32[2,8], index: 1, kind: input, shape index: {}]   ;;  %s2597_s2 = inlined_call_operand.hbm [shape: bf16[300,128], index: 2, kind: input, shape index: {}]   ;;  %s2598_s3 = inlined_call_operand.hbm [shape: bf16[128,128], index: 3, kind: input, shape index: {}]   ;;  %s2599_s4 = inlined_call_operand.hbm [shape: f32[8,512], index: 4, kind: input, shape index: {}]   ;;  %s2600_s5 = inlined_call_operand.vmem [shape: f32[1,512], index: 5, kind: input, shape index: {}]   ;;  %s2601_s6 = inlined_call_operand.hbm [shape: bf16[136,512], index: 6, kind: input, shape index: {}]   ;;  %s2602_s7 = inlined_call_operand.hbm [shape: bf16[512,512], index: 7, kind: input, shape index: {}]   ;;  %s2603_s8 = inlined_call_operand.hbm [shape: f32[2,2], index: 8, kind: output, shape index: {}]  }
   0x1   :  { %14 = vsyncpa [#allocation9], 0 }
   0x2   :  { %15 = vsyncpa [#allocation12], 0 }
   0x3   :  { %16 = vsyncpa [#allocation7], 0  ;;  %s2209_s27 = smov [#allocation8]   ;;  %s2065_s9 = scalar_lea.hbm %s2597_s2, 2432 }
   0x4   :  { %s36_s28 = sshll.u32 %s2209_s27, 4  ;;  %p2066_p0 = scmp.ne.s32.totalorder %s2597_s2, %s2065_s9  ;;  %s37_s28 = int_to_ptr.vmem [resolvable:$true] %s36_s28 }
   0x5   :  { %p2069_p1 = scmp.lt.u32.totalorder %s2065_s9, %s2597_s2 }
   0x7   :  { %p2071_p2 = pnand %p2069_p1, %p2066_p0 }
   0x9   :  { %2074 = shalt.err (!%p2071_p2)
}
   0xa   :  { %s2075_s14 = scalar_lea.vmem %s37_s28, 2432  ;;  %p2080_p4 = scmp.lt.s32.totalorder %s37_s28, %s37_s28 }
   0xb   :  { %p2076_p3 = scmp.ne.s32.totalorder %s37_s28, %s2075_s14  ;;  %p2081_p5 = scmp.lt.s32.totalorder %s2075_s14, %s2075_s14 }
   0xd   :  { %p2082_p6 = por %p2081_p5, %p2080_p4 }
   0xf   :  { %p2083_p7 = pnand %p2082_p6, %p2076_p3 }
  0x11   :  { %2086 = shalt.err (!%p2083_p7)
}
  0x12   :  { %s2210_s15 = smov 64   ;;  %s2211_s16 = smov 4  }
  0x13   :  { %42 = dma.hbm_to_vmem [thread:$0]  %s2597_s2, 2432, %s37_s28, [#allocation9], %s2210_s15, %s2210_s15, %s2211_s16  }
  0x14   :  { %s2212_s19 = smov [#allocation5]   ;;  %s2087_s23 = scalar_lea.hbm %s2595_s0, 768 }
  0x15   :  { %s22_s20 = sshll.u32 %s2212_s19, 4  ;;  %p2088_p8 = scmp.ne.s32.totalorder %s2595_s0, %s2087_s23  ;;  %s23_s20 = int_to_ptr.vmem [resolvable:$true] %s22_s20 }
  0x16   :  { %p2091_p9 = scmp.lt.u32.totalorder %s2087_s23, %s2595_s0 }
  0x18   :  { %p2093_p10 = pnand %p2091_p9, %p2088_p8 }
  0x1a   :  { %2096 = shalt.err (!%p2093_p10)
}
  0x1b   :  { %s2097_s29 = scalar_lea.vmem %s23_s20, 768  ;;  %p2102_p12 = scmp.lt.s32.totalorder %s23_s20, %s23_s20 }
  0x1c   :  { %p2098_p11 = scmp.ne.s32.totalorder %s23_s20, %s2097_s29  ;;  %p2103_p13 = scmp.lt.s32.totalorder %s2097_s29, %s2097_s29 }
  0x1e   :  { %p2104_p0 = por %p2103_p13, %p2102_p12 }
  0x20   :  { %p2105_p1 = pnand %p2104_p0, %p2098_p11 }
  0x22   :  { %2108 = shalt.err (!%p2105_p1)
}
  0x23   :  { %s2213_s2 = smov 384   ;;  %s2214_s28 = smov 24  }
  0x24   :  { %28 = dma.hbm_to_vmem [thread:$0]  %s2595_s0, 768, %s23_s20, [#allocation6], %s2213_s2, %s2213_s2, %s2214_s28  }
  0x25   :  { %s2215_s10 = smov [#allocation10]   ;;  %s2216_s12 = smov [#allocation11]  }
  0x26   :  { %s48_s11 = sshll.u32 %s2215_s10, 4  ;;  %s61_s13 = sshll.u32 %s2216_s12, 4  ;;  %s49_s11 = int_to_ptr.vmem [resolvable:$true] %s48_s11  ;;  %s62_s13 = int_to_ptr.vmem [resolvable:$true] %s61_s13 }
  0x27   :  { %s2109_s18 = scalar_lea.hbm %s2598_s3, 1024 }
  0x28   :  { %p2110_p2 = scmp.ne.s32.totalorder %s2598_s3, %s2109_s18  ;;  %p2113_p3 = scmp.lt.u32.totalorder %s2109_s18, %s2598_s3 }
  0x2a   :  { %p2115_p4 = pnand %p2113_p3, %p2110_p2 }
  0x2c   :  { %2118 = shalt.err (!%p2115_p4)
}
  0x2d   :  { %s2119_s0 = scalar_lea.vmem %s49_s11, 1024  ;;  %p2124_p6 = scmp.lt.s32.totalorder %s49_s11, %s49_s11 }
  0x2e   :  { %p2120_p5 = scmp.ne.s32.totalorder %s49_s11, %s2119_s0  ;;  %p2125_p7 = scmp.lt.s32.totalorder %s2119_s0, %s2119_s0 }
  0x30   :  { %p2126_p8 = por %p2125_p7, %p2124_p6 }
  0x32   :  { %p2127_p9 = pnand %p2126_p8, %p2120_p5 }
  0x34   :  { %2130 = shalt.err (!%p2127_p9)
}
  0x35   :  { %54 = dma.hbm_to_vmem [thread:$0]  %s2598_s3, 1024, %s49_s11, [#allocation9], %s2210_s15, %s2210_s15, %s2211_s16  }
  0x36   :  { %s2131_s27 = scalar_lea.hbm %s2599_s4, 512 }
  0x37   :  { %p2132_p10 = scmp.ne.s32.totalorder %s2599_s4, %s2131_s27  ;;  %p2135_p11 = scmp.lt.u32.totalorder %s2131_s27, %s2599_s4 }
  0x39   :  { %p2137_p12 = pnand %p2135_p11, %p2132_p10 }
  0x3b   :  { %2140 = shalt.err (!%p2137_p12)
}
  0x3c   :  { %s2141_s9 = scalar_lea.vmem %s62_s13, 512  ;;  %p2146_p0 = scmp.lt.s32.totalorder %s62_s13, %s62_s13 }
  0x3d   :  { %p2142_p13 = scmp.ne.s32.totalorder %s62_s13, %s2141_s9  ;;  %p2147_p1 = scmp.lt.s32.totalorder %s2141_s9, %s2141_s9 }
  0x3f   :  { %p2148_p2 = por %p2147_p1, %p2146_p0 }
  0x41   :  { %p2149_p3 = pnand %p2148_p2, %p2142_p13 }
  0x43   :  { %2152 = shalt.err (!%p2149_p3)
}
  0x44   :  { %64 = dma.hbm_to_vmem [thread:$0]  %s2599_s4, 512, %s62_s13, [#allocation12]  }
  0x45   :  { %2197 = dma.done.wait [#allocation6], 768  }
  0x46   :  { %2198 = vsyncadd [#allocation6], 4294966528 }
  0x47   :  { %2199 = dma.done.wait [#allocation9], 3456  }
  0x48   :  { %2200 = vsyncadd [#allocation9], 4294963840 }
  0x49   :  { %2201 = dma.done.wait [#allocation12], 512  }
  0x4a   :  { %2202 = vsyncadd [#allocation12], 4294966784  ;;  %s96_s11 = sld [smem:[#allocation0]]   ;;  %s2217_s12 = smov 512   ;;  %v2218_v0 = vmov 0.0   ;;  %vm2219_vm0 = vmmov 0  }
  0x4b   :  { %108 = sst [smem:[#allocation19]] %s2217_s12  ;;  %1782 = vmatprep.subr.bf16.mxu1 %v2218_v0  ;;  %1788 = vmatprep.mubr.msk.bf16.mxu1 %vm2219_vm0, %v2218_v0  ;;  %s2220_s4 = smov 128  }
  0x4c   :  { %110 = sst [smem:[#allocation19 + $0x1]] %s2217_s12  ;;  %s2221_s13 = smov [#allocation2]  }
  0x4d   :  { %112 = sst [smem:[#allocation19 + $0x2]] %s2211_s16  ;;  %s87_s14 = sshll.u32 %s2221_s13, 4  ;;  %s88_s14 = int_to_ptr.vmem [resolvable:$true] %s87_s14 }
  0x4e   :  { %114 = sst [smem:[#allocation19 + $0x3]] %s2210_s15  ;;  %s2222_s17 = smov 2  }
  0x4f   :  { %116 = sst [smem:[#allocation19 + $0x4]] %s2220_s4  ;;  %s2223_s19 = smov 256  }
  0x50   :  { %118 = sst [smem:[#allocation19 + $0x5]] %s2222_s17  ;;  %s1621_s18 = sshll.u32 %s96_s11, 26 }
  0x51   :  { %120 = sst [smem:[#allocation19 + $0x6]] %s2223_s19  ;;  %s1622_s21 = sadd.s32 134217728, %s1621_s18 }
  0x52   :  { %122 = sst [smem:[#allocation19 + $0x7]] %s2210_s15  ;;  %s2153_s0 = scalar_lea.hbm %s2601_s6, 4352 }
  0x53   :  { %124 = sst [smem:[#allocation19 + $0x8]] %s2211_s16  ;;  %p2154_p4 = scmp.ne.s32.totalorder %s2601_s6, %s2153_s0 }
  0x54   :  { %p2157_p5 = scmp.lt.u32.totalorder %s2153_s0, %s2601_s6 }
  0x56   :  { %p2159_p6 = pnand %p2157_p5, %p2154_p4 }
  0x58   :  { %2162 = shalt.err (!%p2159_p6)  }
  0x59   :  { %s2163_s27 = scalar_lea.vmem %s88_s14, 4352  ;;  %p2168_p8 = scmp.lt.s32.totalorder %s88_s14, %s88_s14 }
  0x5a   :  { %p2164_p7 = scmp.ne.s32.totalorder %s88_s14, %s2163_s27  ;;  %p2169_p9 = scmp.lt.s32.totalorder %s2163_s27, %s2163_s27 }
  0x5c   :  { %p2170_p10 = por %p2169_p9, %p2168_p8 }
  0x5e   :  { %p2171_p11 = pnand %p2170_p10, %p2164_p7 }
  0x60   :  { %2174 = shalt.err (!%p2171_p11)  }
  0x61   :  { %90 = dma.hbm_to_vmem [thread:$0]  %s2601_s6, 4352, %s88_s14, [#allocation4]  ;;  %vm297_vm1 = vcmask 1045504   ;;  %vm293_vm2 = vcmask 359424  }
  0x62   :  { %s2224_s29 = smov [#allocation3]   ;;  %s2225_s28 = smov [#allocation4 + $0x1]  }
  0x63   :  { %s104_s2 = sshll.u32 %s2224_s29, 4  ;;  %s2226_s30 = smov [#allocation18]   ;;  %s105_s2 = int_to_ptr.vmem [resolvable:$true] %s104_s2 }
  0x64   :  { %126 = dma.general %s2602_s7, 16384, %s105_s2, %s2225_s28, %s2226_s30, [#allocation19], %s1622_s21, 0  }
  0x65   :  { %v2350_v1 = vld [vmem:[#allocation11 + $0x1] ss:$8 sm:$0xf]  ;;  %v2352_v2 = vld [vmem:[#allocation11 + $0x2] ss:$8 sm:$0xf] }
  0x66   :  { %v2354_v3 = vld [vmem:[#allocation11 + $0x3] ss:$0 sm:$0xff]  ;;  %v1964_v4 = vld [vmem:[#allocation8 + $0x40] sm:$0xff]   ;;  %v1966_v6 = vld [vmem:[#allocation8 + $0x48] sm:$0xff]  }
  0x67   :  { %v1965_v5 = vld [vmem:[#allocation8] sm:$0xff]   ;;  %1693 = vmatprep.subr.bf16.mxu0 %v1964_v4  ;;  %v1967_v7 = vld [vmem:[#allocation8 + $0x8] sm:$0xff]   ;;  %v1968_v8 = vld [vmem:[#allocation8 + $0x50] sm:$0xff]  }
  0x68   :  { %1694 = vmatpush3.bf16.msra.mxu0 %v1965_v5  ;;  %v1969_v9 = vld [vmem:[#allocation8 + $0x10] sm:$0xff]   ;;  %v1970_v10 = vld [vmem:[#allocation8 + $0x58] sm:$0xff]   ;;  %v1972_v12 = vld [vmem:[#allocation8 + $0x60] sm:$0xff]  }
  0x69   :  { %1695 = vmatprep.subr.bf16.mxu0 %v1966_v6  ;;  %v1971_v11 = vld [vmem:[#allocation8 + $0x18] sm:$0xff]   ;;  %v1976_v13 = vld [vmem:[#allocation8 + $0x80] sm:$0xff]   ;;  %v1979_v15 = vld [vmem:[#allocation8 + $0x88] sm:$0xff]  }
  0x6a   :  { %v1973_v14 = vld [vmem:[#allocation8 + $0x20] sm:$0xff]   ;;  %1783 = vmatpush3.bf16.msra.mxu1 %v1976_v13  ;;  %v1974_v16 = vld [vmem:[#allocation8 + $0x68] sm:$0xff]   ;;  %v134_v17 = vld [vmem:[#allocation5 + $0x8] sm:$0xff] }
  0x6b   :  { %1784 = vmatprep.subr.bf16.mxu1 %v2218_v0  ;;  %v137_v18 = vld [vmem:[#allocation5 + $0x20] sm:$0xff]  ;;  %v1975_v21 = vld [vmem:[#allocation8 + $0x28] sm:$0xff]   ;;  %v135_v23 = vld [vmem:[#allocation5 + $0x10] sm:$0xff] }
  0x6c   :  { %1696 = vmatpush3.bf16.msra.mxu0 %v1967_v7  ;;  %v140_v19 = vpack.c.bf16 %v137_v18, %v134_v17  ;;  %v1982_v20 = vld [vmem:[#allocation8 + $0x90] sm:$0x3f]   ;;  %v138_v25 = vld [vmem:[#allocation5 + $0x28] sm:$0xff]  ;;  %v2362_v30 = vld [vmem:[#allocation10 + $0x8] sm:$0xff]  }
  0x6d   :  { %1697 = vmatprep.subr.bf16.mxu0 %v1968_v8  ;;  %v1977_v22 = vld [vmem:[#allocation8 + $0x70] sm:$0xff]   ;;  %v299_v24 = vsel %vm297_vm1, %v1982_v20, 0  ;;  %v141_v27 = vpack.c.bf16 %v138_v25, %v135_v23  ;;  %v2358_v28 = vld [vmem:[#allocation10] sm:$0xff]   ;;  %v136_v33 = vld [vmem:[#allocation5 + $0x18] sm:$0xff] }
  0x6e   :  { %1785 = vmatpush3.bf16.msra.mxu1 %v1979_v15  ;;  %333 = vmatprep.mubr.bf16.mxu0 %v140_v19  ;;  %v1978_v26 = vld [vmem:[#allocation8 + $0x30] sm:$0xff]   ;;  %v1980_v29 = vld [vmem:[#allocation8 + $0x78] sm:$0xff]   ;;  %v2368_v35 = vld [vmem:[#allocation10 + $0x10] sm:$0xff]  }
  0x6f   :  { %1786 = vmatprep.subr.bf16.mxu1 %v2218_v0  ;;  %v1981_v31 = vld [vmem:[#allocation8 + $0x38] sm:$0xff]   ;;  %v133_v32 = vld [vmem:[#allocation5] sm:$0xff]  ;;  %v2394_v38 = vld [vmem:[#allocation10 + $0x28] sm:$0xff]  }
  0x70   :  { %1698 = vmatpush3.bf16.msra.mxu0 %v1969_v9  ;;  %v139_v34 = vpack.c.bf16 %v136_v33, %v133_v32  ;;  %v2382_v36 = vld [vmem:[#allocation10 + $0x18] sm:$0xff]   ;;  %v2388_v37 = vld [vmem:[#allocation10 + $0x20] sm:$0xff]   ;;  %v2397_v39 = vld [vmem:[#allocation10 + $0x30] sm:$0xff]  }
  0x71   :  { %1699 = vmatprep.subr.bf16.mxu0 %v1970_v10  ;;  %v2403_v40 = vld [vmem:[#allocation10 + $0x38] sm:$0xff]   ;;  %v127_v47 = vld [vmem:[#allocation11] ss:$0 sm:$0xff] }
  0x72   :  { %1787 = vmatpush3.bf16.msra.mxu1 %v299_v24 }
  0x73   :  { %1792 = vmatprep.subr.bf16.mxu1 %v2218_v0 }
  0x74   :  { %1700 = vmatpush3.bf16.msra.mxu0 %v1971_v11 }
  0x75   :  { %1701 = vmatprep.subr.bf16.mxu0 %v1972_v12  ;;  %1789 = vmatmul.mubr.msk.bf16.vlgmr.msra.gmra.mrb[0].mxu1 %vm293_vm2, %v141_v27 }
  0x76   :  { %1793 = vmatpush3.bf16.msra.mxu1 %v2358_v28  ;;  %1808 = vmatprep.mubr.msk.bf16.mxu1 %vm2219_vm0, %v2218_v0 }
  0x77   :  { %1794 = vmatprep.subr.bf16.mxu1 %v2218_v0 }
  0x78   :  { %1702 = vmatpush3.bf16.msra.mxu0 %v1973_v14 }
  0x79   :  { %1703 = vmatprep.subr.bf16.mxu0 %v1974_v16 }
  0x7a   :  { %1795 = vmatpush3.bf16.msra.mxu1 %v2362_v30 }
  0x7b   :  { %1796 = vmatprep.subr.bf16.mxu1 %v2218_v0 }
  0x7c   :  { %1704 = vmatpush3.bf16.msra.mxu0 %v1975_v21 }
  0x7d   :  { %1705 = vmatprep.subr.bf16.mxu0 %v1977_v22 }
  0x7e   :  { %1797 = vmatpush3.bf16.msra.mxu1 %v2368_v35 }
  0x7f   :  { %1798 = vmatprep.subr.bf16.mxu1 %v2218_v0 }
  0x80   :  { %1706 = vmatpush3.bf16.msra.mxu0 %v1978_v26 }
  0x81   :  { %1707 = vmatprep.subr.bf16.mxu0 %v1980_v29 }
  0x82   :  { %1799 = vmatpush3.bf16.msra.mxu1 %v2382_v36 }
  0x83   :  { %1800 = vmatprep.subr.bf16.mxu1 %v2218_v0 }
  0x84   :  { %1708 = vmatpush3.bf16.msra.mxu0 %v1981_v31 }
  0x85   :  { %1812 = vmatprep.subr.bf16.mxu0 %v2218_v0 }
  0x86   :  { %1801 = vmatpush3.bf16.msra.mxu1 %v2388_v37 }
  0x87   :  { %334 = vmatmul.mubr.bf16.vlgmr.msra.gmra.mrb[0].mxu0 %v139_v34  ;;  %1802 = vmatprep.subr.bf16.mxu1 %v2218_v0 }
  0x88   :  { %1813 = vmatpush3.bf16.msra.mxu0 %v2358_v28  ;;  %1828 = vmatprep.mubr.msk.bf16.mxu0 %vm2219_vm0, %v2218_v0 }
  0x89   :  { %1814 = vmatprep.subr.bf16.mxu0 %v2218_v0 }
  0x8a   :  { %1803 = vmatpush3.bf16.msra.mxu1 %v2394_v38 }
  0x8b   :  { %1804 = vmatprep.subr.bf16.mxu1 %v2218_v0 }
  0x8c   :  { %1815 = vmatpush3.bf16.msra.mxu0 %v2362_v30 }
  0x8d   :  { %1816 = vmatprep.subr.bf16.mxu0 %v2218_v0 }
  0x8e   :  { %1805 = vmatpush3.bf16.msra.mxu1 %v2397_v39 }
  0x8f   :  { %1806 = vmatprep.subr.bf16.mxu1 %v2218_v0 }
  0x90   :  { %1817 = vmatpush3.bf16.msra.mxu0 %v2368_v35 }
  0x91   :  { %1818 = vmatprep.subr.bf16.mxu0 %v2218_v0 }
  0x92   :  { %1807 = vmatpush3.bf16.msra.mxu1 %v2403_v40 }
  0x93   :  { %1832 = vmatprep.subr.bf16.mxu1 %v2218_v0 }
  0x94   :  { %1819 = vmatpush3.bf16.msra.mxu0 %v2382_v36 }
  0x95   :  { %1820 = vmatprep.subr.bf16.mxu0 %v2218_v0 }
  0x98   :  { %1821 = vmatpush3.bf16.msra.mxu0 %v2388_v37 }
  0x99   :  { %1822 = vmatprep.subr.bf16.mxu0 %v2218_v0 }
  0x9c   :  { %1823 = vmatpush3.bf16.msra.mxu0 %v2394_v38 }
  0x9d   :  { %1824 = vmatprep.subr.bf16.mxu0 %v2218_v0 }
  0xa0   :  { %1825 = vmatpush3.bf16.msra.mxu0 %v2397_v39 }
  0xa1   :  { %1826 = vmatprep.subr.bf16.mxu0 %v2218_v0 }
  0xa4   :  { %1827 = vmatpush3.bf16.msra.mxu0 %v2403_v40 }
  0xa5   :  { %1852 = vmatprep.subr.bf16.mxu0 %v2218_v0 }
 0x148   :  { %v376_v41 = vpop.f32.mrb[0].mxu1 }
 0x149   :  { %v1790_v42 = vpop.f32.mrb[1].mxu1 }
 0x14a   :  { %v379_v43 = vpop.f32.mrb[2].mxu1 }
 0x14b   :  { %v1791_v44 = vpop.f32.mrb[3].mxu1 }
 0x15a   :  { %v1709_v45 = vpop.f32.mrb[0].mxu0 }
 0x15b   :  { %v1710_v46 = vpop.f32.mrb[1].mxu0 }
 0x15c   :  { %v1711_v48 = vadd.f32 %v1710_v46, %v1709_v45  ;;  %v1712_v49 = vpop.f32.mrb[2].mxu0 }
 0x15d   :  { %v1713_v50 = vpop.f32.mrb[3].mxu0 }
 0x15e   :  { %v336_v51 = vadd.f32 %v1711_v48, %v127_v47  ;;  %v1714_v52 = vadd.f32 %v1713_v50, %v1712_v49 }
 0x160   :  { %v2412_v53 = vadd.f32 %v376_v41, %v336_v51  ;;  %v339_v54 = vadd.f32 %v1714_v52, %v127_v47 }
 0x162   :  { %1991 = vtanh.f32 %v2412_v53  ;;  %v2415_v55 = vadd.f32 %v379_v43, %v339_v54 }
 0x16c   :  { %v1992_v56 = vpop.eup %1991 }
 0x16d   :  { %v384_v57 = vpack.c.bf16 %v1992_v56, %v1992_v56 }
 0x16f   :  { %1809 = vmatmul.mubr.bf16.vlgmr.msra.gmra.mrb[4].mxu1 %v384_v57 }
 0x170   :  { %1833 = vmatpush3.bf16.msra.mxu1 %v2358_v28  ;;  %1848 = vmatprep.mubr.msk.bf16.mxu1 %vm2219_vm0, %v2218_v0 }
 0x171   :  { %1834 = vmatprep.subr.bf16.mxu1 %v2218_v0 }
 0x174   :  { %1835 = vmatpush3.bf16.msra.mxu1 %v2362_v30 }
 0x175   :  { %1836 = vmatprep.subr.bf16.mxu1 %v2218_v0 }
 0x178   :  { %1837 = vmatpush3.bf16.msra.mxu1 %v2368_v35 }
 0x179   :  { %1838 = vmatprep.subr.bf16.mxu1 %v2218_v0 }
 0x17c   :  { %1839 = vmatpush3.bf16.msra.mxu1 %v2382_v36 }
 0x17d   :  { %1840 = vmatprep.subr.bf16.mxu1 %v2218_v0 }
 0x180   :  { %1841 = vmatpush3.bf16.msra.mxu1 %v2388_v37 }
 0x181   :  { %1842 = vmatprep.subr.bf16.mxu1 %v2218_v0 }
 0x184   :  { %1843 = vmatpush3.bf16.msra.mxu1 %v2394_v38 }
 0x185   :  { %1844 = vmatprep.subr.bf16.mxu1 %v2218_v0 }
 0x188   :  { %1845 = vmatpush3.bf16.msra.mxu1 %v2397_v39 }
 0x189   :  { %1846 = vmatprep.subr.bf16.mxu1 %v2218_v0 }
 0x18c   :  { %1847 = vmatpush3.bf16.msra.mxu1 %v2403_v40 }
 0x18d   :  { %1872 = vmatprep.subr.bf16.mxu1 %v2218_v0 }
 0x242   :  { %v483_v58 = vpop.f32.mrb[4].mxu1 }
 0x243   :  { %v490_v59 = vrot.slane %v483_v58, 6  ;;  %v1810_v60 = vpop.f32.mrb[5].mxu1 }
 0x244   :  { %v486_v61 = vpop.f32.mrb[6].mxu1 }
 0x245   :  { %v492_v62 = vadd.f32 %v490_v59, %v2412_v53  ;;  %v1811_v63 = vpop.f32.mrb[7].mxu1 }
 0x247   :  { %1993 = vtanh.f32 %v492_v62 }
 0x251   :  { %v1994_v4 = vpop.eup %1993 }
 0x252   :  { %v494_v5 = vpack.c.bf16 %v1994_v4, %v1994_v4 }
 0x254   :  { %v496_v6 = vrot.slane %v494_v5, 1 }
 0x256   :  { %1829 = vmatmul.mubr.bf16.vlgmr.msra.gmra.mrb[4].mxu0 %v496_v6 }
 0x257   :  { %1853 = vmatpush3.bf16.msra.mxu0 %v2358_v28  ;;  %1868 = vmatprep.mubr.msk.bf16.mxu0 %vm2219_vm0, %v2218_v0 }
 0x258   :  { %1854 = vmatprep.subr.bf16.mxu0 %v2218_v0 }
 0x25b   :  { %1855 = vmatpush3.bf16.msra.mxu0 %v2362_v30 }
 0x25c   :  { %1856 = vmatprep.subr.bf16.mxu0 %v2218_v0 }
 0x25f   :  { %1857 = vmatpush3.bf16.msra.mxu0 %v2368_v35 }
 0x260   :  { %1858 = vmatprep.subr.bf16.mxu0 %v2218_v0 }
 0x263   :  { %1859 = vmatpush3.bf16.msra.mxu0 %v2382_v36 }
 0x264   :  { %1860 = vmatprep.subr.bf16.mxu0 %v2218_v0 }
 0x267   :  { %1861 = vmatpush3.bf16.msra.mxu0 %v2388_v37 }
 0x268   :  { %1862 = vmatprep.subr.bf16.mxu0 %v2218_v0 }
 0x26b   :  { %1863 = vmatpush3.bf16.msra.mxu0 %v2394_v38 }
 0x26c   :  { %1864 = vmatprep.subr.bf16.mxu0 %v2218_v0 }
 0x26f   :  { %1865 = vmatpush3.bf16.msra.mxu0 %v2397_v39 }
 0x270   :  { %1866 = vmatprep.subr.bf16.mxu0 %v2218_v0 }
 0x273   :  { %1867 = vmatpush3.bf16.msra.mxu0 %v2403_v40 }
 0x274   :  { %1892 = vmatprep.subr.bf16.mxu0 %v2218_v0 }
 0x329   :  { %v532_v7 = vpop.f32.mrb[4].mxu0 }
 0x32a   :  { %v539_v8 = vrot.slane %v532_v7, 4  ;;  %v1830_v9 = vpop.f32.mrb[5].mxu0 }
 0x32b   :  { %v535_v10 = vpop.f32.mrb[6].mxu0 }
 0x32c   :  { %v541_v11 = vadd.f32 %v539_v8, %v2412_v53  ;;  %v1831_v12 = vpop.f32.mrb[7].mxu0 }
 0x32e   :  { %1995 = vtanh.f32 %v541_v11 }
 0x338   :  { %v1996_v13 = vpop.eup %1995 }
 0x339   :  { %v543_v14 = vpack.c.bf16 %v1996_v13, %v1996_v13 }
 0x33b   :  { %v545_v15 = vrot.slane %v543_v14, 2 }
 0x33d   :  { %1849 = vmatmul.mubr.bf16.vlgmr.msra.gmra.mrb[8].mxu1 %v545_v15 }
 0x33e   :  { %1873 = vmatpush3.bf16.msra.mxu1 %v2358_v28  ;;  %1888 = vmatprep.mubr.msk.bf16.mxu1 %vm2219_vm0, %v2218_v0 }
 0x33f   :  { %1874 = vmatprep.subr.bf16.mxu1 %v2218_v0 }
 0x342   :  { %1875 = vmatpush3.bf16.msra.mxu1 %v2362_v30 }
 0x343   :  { %1876 = vmatprep.subr.bf16.mxu1 %v2218_v0 }
 0x346   :  { %1877 = vmatpush3.bf16.msra.mxu1 %v2368_v35 }
 0x347   :  { %1878 = vmatprep.subr.bf16.mxu1 %v2218_v0 }
 0x34a   :  { %1879 = vmatpush3.bf16.msra.mxu1 %v2382_v36 }
 0x34b   :  { %1880 = vmatprep.subr.bf16.mxu1 %v2218_v0 }
 0x34e   :  { %1881 = vmatpush3.bf16.msra.mxu1 %v2388_v37 }
 0x34f   :  { %1882 = vmatprep.subr.bf16.mxu1 %v2218_v0 }
 0x352   :  { %1883 = vmatpush3.bf16.msra.mxu1 %v2394_v38 }
 0x353   :  { %1884 = vmatprep.subr.bf16.mxu1 %v2218_v0 }
 0x356   :  { %1885 = vmatpush3.bf16.msra.mxu1 %v2397_v39 }
 0x357   :  { %1886 = vmatprep.subr.bf16.mxu1 %v2218_v0 }
 0x35a   :  { %1887 = vmatpush3.bf16.msra.mxu1 %v2403_v40 }
 0x35b   :  { %1912 = vmatprep.subr.bf16.mxu1 %v2218_v0 }
 0x410   :  { %v581_v16 = vpop.f32.mrb[8].mxu1 }
 0x411   :  { %v588_v17 = vrot.slane %v581_v16, 2  ;;  %v1850_v18 = vpop.f32.mrb[9].mxu1 }
 0x412   :  { %v584_v19 = vpop.f32.mrb[10].mxu1 }
 0x413   :  { %v590_v20 = vadd.f32 %v588_v17, %v2412_v53  ;;  %v1851_v21 = vpop.f32.mrb[11].mxu1 }
 0x415   :  { %1997 = vtanh.f32 %v590_v20 }
 0x41f   :  { %v1998_v22 = vpop.eup %1997 }
 0x420   :  { %v592_v23 = vpack.c.bf16 %v1998_v22, %v1998_v22 }
 0x422   :  { %v594_v24 = vrot.slane %v592_v23, 3 }
 0x424   :  { %1869 = vmatmul.mubr.bf16.vlgmr.msra.gmra.mrb[8].mxu0 %v594_v24 }
 0x425   :  { %1893 = vmatpush3.bf16.msra.mxu0 %v2358_v28  ;;  %1908 = vmatprep.mubr.msk.bf16.mxu0 %vm2219_vm0, %v2218_v0 }
 0x426   :  { %1894 = vmatprep.subr.bf16.mxu0 %v2218_v0 }
 0x429   :  { %1895 = vmatpush3.bf16.msra.mxu0 %v2362_v30 }
 0x42a   :  { %1896 = vmatprep.subr.bf16.mxu0 %v2218_v0 }
 0x42d   :  { %1897 = vmatpush3.bf16.msra.mxu0 %v2368_v35 }
 0x42e   :  { %1898 = vmatprep.subr.bf16.mxu0 %v2218_v0 }
 0x431   :  { %1899 = vmatpush3.bf16.msra.mxu0 %v2382_v36 }
 0x432   :  { %1900 = vmatprep.subr.bf16.mxu0 %v2218_v0 }
 0x435   :  { %1901 = vmatpush3.bf16.msra.mxu0 %v2388_v37 }
 0x436   :  { %1902 = vmatprep.subr.bf16.mxu0 %v2218_v0 }
 0x439   :  { %1903 = vmatpush3.bf16.msra.mxu0 %v2394_v38 }
 0x43a   :  { %1904 = vmatprep.subr.bf16.mxu0 %v2218_v0 }
 0x43d   :  { %1905 = vmatpush3.bf16.msra.mxu0 %v2397_v39 }
 0x43e   :  { %1906 = vmatprep.subr.bf16.mxu0 %v2218_v0 }
 0x441   :  { %1907 = vmatpush3.bf16.msra.mxu0 %v2403_v40 }
 0x4f7   :  { %v630_v25 = vpop.f32.mrb[8].mxu0 }
 0x4f8   :  { %v636_v26 = vadd.f32 %v630_v25, %v2415_v55  ;;  %v1870_v27 = vpop.f32.mrb[9].mxu0 }
 0x4f9   :  { %v633_v29 = vpop.f32.mrb[10].mxu0 }
 0x4fa   :  { %1999 = vtanh.f32 %v636_v26  ;;  %v1871_v31 = vpop.f32.mrb[11].mxu0 }
 0x504   :  { %v2000_v32 = vpop.eup %1999 }
 0x505   :  { %v638_v33 = vpack.c.bf16 %v2000_v32, %v2000_v32 }
 0x507   :  { %1889 = vmatmul.mubr.bf16.vlgmr.msra.gmra.mrb[12].mxu1 %v638_v33 }
 0x508   :  { %1913 = vmatpush3.bf16.msra.mxu1 %v2358_v28  ;;  %1928 = vmatprep.mubr.msk.bf16.mxu1 %vm2219_vm0, %v2218_v0 }
 0x509   :  { %1914 = vmatprep.subr.bf16.mxu1 %v2218_v0 }
 0x50c   :  { %1915 = vmatpush3.bf16.msra.mxu1 %v2362_v30 }
 0x50d   :  { %1916 = vmatprep.subr.bf16.mxu1 %v2218_v0 }
 0x510   :  { %1917 = vmatpush3.bf16.msra.mxu1 %v2368_v35 }
 0x511   :  { %1918 = vmatprep.subr.bf16.mxu1 %v2218_v0 }
 0x514   :  { %1919 = vmatpush3.bf16.msra.mxu1 %v2382_v36 }
 0x515   :  { %1920 = vmatprep.subr.bf16.mxu1 %v2218_v0 }
 0x518   :  { %1921 = vmatpush3.bf16.msra.mxu1 %v2388_v37 }
 0x519   :  { %1922 = vmatprep.subr.bf16.mxu1 %v2218_v0 }
 0x51c   :  { %1923 = vmatpush3.bf16.msra.mxu1 %v2394_v38 }
 0x51d   :  { %1924 = vmatprep.subr.bf16.mxu1 %v2218_v0 }
 0x520   :  { %1925 = vmatpush3.bf16.msra.mxu1 %v2397_v39 }
 0x521   :  { %1926 = vmatprep.subr.bf16.mxu1 %v2218_v0 }
 0x524   :  { %1927 = vmatpush3.bf16.msra.mxu1 %v2403_v40 }
 0x5da   :  { %v673_v28 = vpop.f32.mrb[12].mxu1 }
 0x5db   :  { %v680_v30 = vrot.slane %v673_v28, 6  ;;  %v1890_v34 = vpop.f32.mrb[13].mxu1 }
 0x5dc   :  { %v676_v35 = vpop.f32.mrb[14].mxu1 }
 0x5dd   :  { %v682_v36 = vadd.f32 %v680_v30, %v2415_v55  ;;  %v1891_v41 = vpop.f32.mrb[15].mxu1 }
 0x5df   :  { %2001 = vtanh.f32 %v682_v36 }
 0x5e9   :  { %v2002_v37 = vpop.eup %2001 }
 0x5ea   :  { %v684_v42 = vpack.c.bf16 %v2002_v37, %v2002_v37 }
 0x5ec   :  { %v686_v43 = vrot.slane %v684_v42, 1 }
 0x5ee   :  { %1909 = vmatmul.mubr.bf16.vlgmr.msra.gmra.mrb[12].mxu0 %v686_v43 }
 0x6c1   :  { %v722_v38 = vpop.f32.mrb[12].mxu0 }
 0x6c2   :  { %v729_v44 = vrot.slane %v722_v38, 4  ;;  %v1910_v45 = vpop.f32.mrb[13].mxu0 }
 0x6c3   :  { %v725_v39 = vpop.f32.mrb[14].mxu0 }
 0x6c4   :  { %v731_v0 = vadd.f32 %v729_v44, %v2415_v55  ;;  %v1911_v46 = vpop.f32.mrb[15].mxu0 }
 0x6c6   :  { %2003 = vtanh.f32 %v731_v0 }
 0x6d0   :  { %v2004_v40 = vpop.eup %2003 }
 0x6d1   :  { %v733_v47 = vpack.c.bf16 %v2004_v40, %v2004_v40 }
 0x6d3   :  { %v735_v48 = vrot.slane %v733_v47, 2 }
 0x6d5   :  { %1929 = vmatmul.mubr.bf16.vlgmr.msra.gmra.mrb[16].mxu1 %v735_v48 }
 0x7a8   :  { %v771_v49 = vpop.f32.mrb[16].mxu1 }
 0x7a9   :  { %v778_v50 = vrot.slane %v771_v49, 2  ;;  %v1930_v51 = vpop.f32.mrb[17].mxu1 }
 0x7aa   :  { %v774_v52 = vpop.f32.mrb[18].mxu1 }
 0x7ab   :  { %v780_v53 = vadd.f32 %v778_v50, %v2415_v55  ;;  %v1931_v54 = vpop.f32.mrb[19].mxu1 }
 0x7ad   :  { %2005 = vtanh.f32 %v780_v53 }
 0x7b7   :  { %v2512_v56 = vpop.eup %2005 }
 0x7b8   :  { %2203 = dma.done.wait [#allocation4], 4352 }
 0x7b9   :  { %2204 = vsyncadd [#allocation4], 4294962944  ;;  %v2227_v57 = vmov 0   ;;  %v821_v58 = vld [vmem:[#allocation2 + $0x100] sm:$0xff]  ;;  %vm837_vm3 = vcmask 1043456   ;;  %v822_v63 = vld [vmem:[#allocation2 + $0x108] sm:$0xff]  ;;  %v786_v33 = vpack.c.bf16 %v2512_v56, %v2512_v56  ;;  %v1178_v48 = vlaneseq }
 0x7ba   :  { %882 = vmatprep.mubr.bf16.mxu0 %v2227_v57  ;;  %1127 = vmatprep.mubr.bf16.mxu1 %v2227_v57  ;;  %v1652_v59 = vcombine.high %v821_v58, %v821_v58  ;;  %v2008_v60 = vld [vmem:[#allocation2 + $0x4] ss:$16 sps:$4 sm:$0xff]   ;;  %v1651_v61 = vcombine.low %v821_v58, %v821_v58  ;;  %v2011_v62 = vld [vmem:[#allocation2] ss:$16 sps:$4 sm:$0xff]   ;;  %v1654_v6 = vcombine.high %v822_v63, %v822_v63  ;;  %vm833_vm4 = vcmask 64512  }
 0x7bb   :  { %v819_v55 = vld [vmem:[%s2596_s1] sm:$0x3]  ;;  %1095 = vmatprep.subr.bf16.mxu1 %v2008_v60  ;;  %v2013_v7 = vld [vmem:[#allocation2 + $0x24] ss:$16 sps:$4 sm:$0xff]   ;;  %v1653_v8 = vcombine.low %v822_v63, %v822_v63  ;;  %v2022_v12 = vld [vmem:[#allocation2 + $0xc] ss:$16 sps:$4 sm:$0xff]  }
 0x7bc   :  { %1655 = vmatprep.subr.msk.bf16.mxu0 %vm837_vm3, %v1652_v59  ;;  %v839_v4 = vsel %vm837_vm3, %v1651_v61, 0  ;;  %v820_v5 = vpack.c.bf16 %v819_v55, %v819_v55  ;;  %1096 = vmatpush1.bf16.msra.mxu1 %v2011_v62  ;;  %v2016_v9 = vld [vmem:[#allocation2 + $0x20] ss:$16 sps:$4 sm:$0xff]   ;;  %v2017_v11 = vld [vmem:[#allocation2 + $0x44] ss:$16 sps:$4 sm:$0xff]   ;;  %v933_v35 = vrot.slane %v786_v33, 3 }
 0x7bd   :  { %851 = vmatpush1.bf16.msra.mxu0 %v839_v4  ;;  %1097 = vmatprep.subr.bf16.mxu1 %v2013_v7  ;;  %v845_v10 = vsel %vm837_vm3, %v1653_v8, 0  ;;  %v2019_v13 = vld [vmem:[#allocation2 + $0x40] ss:$16 sps:$4 sm:$0xff]   ;;  %v2023_v14 = vld [vmem:[#allocation2 + $0x64] ss:$16 sps:$4 sm:$0xff]   ;;  %v1179_v49 = vshrl.u32 %v1178_v48, 7 }
 0x7be   :  { %1657 = vmatprep.subr.msk.bf16.mxu0 %vm837_vm3, %v1654_v6  ;;  %v2020_v15 = vld [vmem:[#allocation2 + $0x8] ss:$16 sps:$4 sm:$0xff]   ;;  %v2025_v16 = vld [vmem:[#allocation2 + $0x60] ss:$16 sps:$4 sm:$0xff]   ;;  %v2028_v17 = vld [vmem:[#allocation2 + $0x2c] ss:$16 sps:$4 sm:$0xff]  }
 0x7bf   :  { %v2029_v18 = vld [vmem:[#allocation2 + $0x84] ss:$16 sps:$4 sm:$0xff]   ;;  %v2026_v19 = vld [vmem:[#allocation2 + $0x28] ss:$16 sps:$4 sm:$0xff]   ;;  %v2031_v20 = vld [vmem:[#allocation2 + $0x80] ss:$16 sps:$4 sm:$0xff]  }
 0x7c0   :  { %1656 = vmatmul.mubr.msk.bf16.vlgmr.msra.gmra.mrb[16].mxu0 %vm833_vm4, %v820_v5  ;;  %1098 = vmatpush1.bf16.msra.mxu1 %v2016_v9  ;;  %v2034_v21 = vld [vmem:[#allocation2 + $0x4c] ss:$16 sps:$4 sm:$0xff]   ;;  %v2035_v22 = vld [vmem:[#allocation2 + $0xa4] ss:$16 sps:$4 sm:$0xff]   ;;  %v2032_v23 = vld [vmem:[#allocation2 + $0x48] ss:$16 sps:$4 sm:$0xff]  }
 0x7c1   :  { %892 = vmatpush1.bf16.msra.mxu0 %v845_v10  ;;  %1099 = vmatprep.subr.bf16.mxu1 %v2017_v11  ;;  %v2037_v24 = vld [vmem:[#allocation2 + $0xa0] ss:$16 sps:$4 sm:$0xff]   ;;  %v2040_v25 = vld [vmem:[#allocation2 + $0x6c] ss:$16 sps:$4 sm:$0xff]   ;;  %v2041_v26 = vld [vmem:[#allocation2 + $0xc4] ss:$16 sps:$4 sm:$0xff]  }
 0x7c2   :  { %923 = vmatprep.mubr.bf16.mxu0 %v2227_v57  ;;  %1136 = vmatprep.subr.bf16.mxu0 %v2022_v12  ;;  %v2038_v27 = vld [vmem:[#allocation2 + $0x68] ss:$16 sps:$4 sm:$0xff]   ;;  %v2043_v29 = vld [vmem:[#allocation2 + $0xc0] ss:$16 sps:$4 sm:$0xff]   ;;  %v2046_v31 = vld [vmem:[#allocation2 + $0x8c] ss:$16 sps:$4 sm:$0xff]  }
 0x7c3   :  { %v2047_v32 = vld [vmem:[#allocation2 + $0xe4] ss:$16 sps:$4 sm:$0xff]   ;;  %v2044_v28 = vld [vmem:[#allocation2 + $0x88] ss:$16 sps:$4 sm:$0xff]   ;;  %v2049_v30 = vld [vmem:[#allocation2 + $0xe0] ss:$16 sps:$4 sm:$0xff]  }
 0x7c4   :  { %1100 = vmatpush1.bf16.msra.mxu1 %v2019_v13  ;;  %v2052_v34 = vld [vmem:[#allocation2 + $0xac] ss:$16 sps:$4 sm:$0xff]   ;;  %v2050_v36 = vld [vmem:[#allocation2 + $0xa8] ss:$16 sps:$4 sm:$0xff]   ;;  %v2530_v50 = vsub.s32 0, %v1179_v49  ;;  %v2532_v51 = vsub.s32 1, %v1179_v49 }
 0x7c5   :  { %1101 = vmatprep.subr.bf16.mxu1 %v2023_v14  ;;  %v2055_v41 = vld [vmem:[#allocation2 + $0xcc] ss:$16 sps:$4 sm:$0xff]   ;;  %v2053_v37 = vld [vmem:[#allocation2 + $0xc8] ss:$16 sps:$4 sm:$0xff]   ;;  %v2543_v6 = vsub.s32 3, %v1179_v49 }
 0x7c6   :  { %v2058_v42 = vld [vmem:[#allocation2 + $0xec] ss:$16 sps:$4 sm:$0xff]   ;;  %v2056_v43 = vld [vmem:[#allocation2 + $0xe8] ss:$16 sps:$4 sm:$0xff]   ;;  %v1181_v52 = vrot.slane %v2350_v1, %v2530_v50  ;;  %v1185_v54 = vrot.slane %v2350_v1, %v2532_v51 }
 0x7c7   :  { %v1193_v9 = vrot.slane %v2350_v1, %v2543_v6 }
 0x7c8   :  { %1658 = vmatmul.mubr.msk.bf16.vlgmr.msra.gmra.mrb[20].mxu0 %vm833_vm4, %v820_v5  ;;  %1102 = vmatpush1.bf16.msra.mxu1 %v2025_v16  ;;  %v2541_v5 = vsub.s32 2, %v1179_v49 }
 0x7c9   :  { %1137 = vmatpush1.bf16.msra.mxu0 %v2020_v15  ;;  %1103 = vmatprep.subr.bf16.mxu1 %v2029_v18 }
 0x7ca   :  { %1138 = vmatprep.subr.bf16.mxu0 %v2028_v17  ;;  %1168 = vmatprep.mubr.bf16.mxu0 %v2227_v57  ;;  %v1189_v7 = vrot.slane %v2350_v1, %v2541_v5 }
 0x7cc   :  { %1104 = vmatpush1.bf16.msra.mxu1 %v2031_v20 }
 0x7cd   :  { %1139 = vmatpush1.bf16.msra.mxu0 %v2026_v19  ;;  %1105 = vmatprep.subr.bf16.mxu1 %v2035_v22 }
 0x7ce   :  { %1140 = vmatprep.subr.bf16.mxu0 %v2034_v21 }
 0x7d0   :  { %1106 = vmatpush1.bf16.msra.mxu1 %v2037_v24 }
 0x7d1   :  { %1141 = vmatpush1.bf16.msra.mxu0 %v2032_v23  ;;  %1107 = vmatprep.subr.bf16.mxu1 %v2041_v26 }
 0x7d2   :  { %1142 = vmatprep.subr.bf16.mxu0 %v2040_v25 }
 0x7d4   :  { %1108 = vmatpush1.bf16.msra.mxu1 %v2043_v29 }
 0x7d5   :  { %1143 = vmatpush1.bf16.msra.mxu0 %v2038_v27  ;;  %1109 = vmatprep.subr.bf16.mxu1 %v2047_v32 }
 0x7d6   :  { %1144 = vmatprep.subr.bf16.mxu0 %v2046_v31 }
 0x7d8   :  { %1110 = vmatpush1.bf16.msra.mxu1 %v2049_v30 }
 0x7d9   :  { %1145 = vmatpush1.bf16.msra.mxu0 %v2044_v28 }
 0x7da   :  { %1146 = vmatprep.subr.bf16.mxu0 %v2052_v34 }
 0x7db   :  { %1128 = vmatmul.mubr.bf16.vlgmr.msra.gmra.mrb[20].mxu1 %v933_v35 }
 0x7dd   :  { %1147 = vmatpush1.bf16.msra.mxu0 %v2050_v36 }
 0x7de   :  { %1148 = vmatprep.subr.bf16.mxu0 %v2055_v41 }
 0x7e1   :  { %1149 = vmatpush1.bf16.msra.mxu0 %v2053_v37 }
 0x7e2   :  { %1150 = vmatprep.subr.bf16.mxu0 %v2058_v42 }
 0x7e5   :  { %1151 = vmatpush1.bf16.msra.mxu0 %v2056_v43 }
 0x7e8   :  { %1169 = vmatmul.mubr.bf16.vlgmr.msra.gmra.mrb[24].mxu0 %v933_v35 }
 0x893   :  { %v884_v38 = vpop.f32.mrb[16].mxu0 }
 0x894   :  { %v886_v44 = vpop.f32.mrb[17].mxu0 }
 0x895   :  { %v888_v45 = vpop.f32.mrb[18].mxu0 }
 0x896   :  { %v889_v39 = vpop.f32.mrb[19].mxu0 }
 0x89b   :  { %v925_v0 = vpop.f32.mrb[20].mxu0 }
 0x89c   :  { %v927_v46 = vpop.f32.mrb[21].mxu0 }
 0x89d   :  { %v929_v40 = vpop.f32.mrb[22].mxu0 }
 0x89e   :  { %v930_v47 = vpop.f32.mrb[23].mxu0 }
 0x8ae   :  { %v1129_v53 = vpop.f32.mrb[20].mxu1 }
 0x8af   :  { %v1130_v56 = vadd.f32 %v1129_v53, %v884_v38  ;;  %v1131_v58 = vpop.f32.mrb[21].mxu1 }
 0x8b0   :  { %v1132_v59 = vadd.f32 %v1131_v58, %v886_v44  ;;  %v1133_v60 = vpop.f32.mrb[22].mxu1 }
 0x8b1   :  { %v2538_v61 = vadd.f32 %v1181_v52, %v1130_v56  ;;  %v1134_v62 = vpop.f32.mrb[23].mxu1 }
 0x8b2   :  { %v1199_v55 = vadd.f32 %v1185_v54, %v1132_v59 }
 0x8b3   :  { %v1202_v63 = vmax.f32 %v2538_v61, 0.0 }
 0x8b4   :  { %v1203_v4 = vmax.f32 %v1199_v55, 0.0 }
 0x8bb   :  { %v1170_v8 = vpop.f32.mrb[24].mxu0 }
 0x8bc   :  { %v1171_v10 = vadd.f32 %v1170_v8, %v925_v0  ;;  %v1172_v11 = vpop.f32.mrb[25].mxu0 }
 0x8bd   :  { %v1173_v12 = vadd.f32 %v1172_v11, %v927_v46  ;;  %v1174_v13 = vpop.f32.mrb[26].mxu0 }
 0x8be   :  { %v2549_v14 = vadd.f32 %v1189_v7, %v1171_v10  ;;  %v1175_v15 = vpop.f32.mrb[27].mxu0 }
 0x8bf   :  { %v2551_v16 = vadd.f32 %v1193_v9, %v1173_v12 }
 0x8c0   :  { %v1204_v17 = vmax.f32 %v2549_v14, 0.0 }
 0x8c1   :  { %v1205_v18 = vmax.f32 %v2551_v16, 0.0 }
 0x8c2   :  { %2205 = dma.done.wait [#allocation4 + $0x1], 16384 }
 0x8c3   :  { %2206 = vsyncadd [#allocation4 + $0x1], 4294950912  ;;  %v1211_v19 = vpack.c.bf16 %v1203_v4, %v1203_v4  ;;  %2059 = vset.pattern.permute.xlu0 %v2227_v57  ;;  %2060 = vset.pattern.permute.xlu1 %v2227_v57  ;;  %v1215_v1 = vld [vmem:[#allocation3 + $0x8] sm:$0xff]  ;;  %v1217_v20 = vld [vmem:[#allocation3 + $0x18] sm:$0xff]  ;;  %v1358_v14 = vrot.slane %v2352_v2, %v2543_v6  ;;  %vm1557_vm5 = vcmask 1041408   ;;  %vm1589_vm7 = vcmask 9216  }
 0x8c4   :  { %v1214_v21 = vld [vmem:[#allocation3] sm:$0xff]  ;;  %1363 = vmatprep.subr.bf16.mxu1 %v1215_v1  ;;  %1445 = vmatprep.subr.bf16.mxu0 %v1217_v20  ;;  %v1216_v22 = vld [vmem:[#allocation3 + $0x10] sm:$0xff]  ;;  %v1219_v23 = vld [vmem:[#allocation3 + $0x28] sm:$0xff] }
 0x8c5   :  { %1395 = vmatprep.mubr.bf16.mxu1 %v1211_v19  ;;  %1477 = vmatprep.mubr.bf16.mxu0 %v1211_v19  ;;  %v1221_v24 = vld [vmem:[#allocation3 + $0x38] sm:$0xff]  ;;  %v1218_v25 = vld [vmem:[#allocation3 + $0x20] sm:$0xff]  ;;  %v1220_v26 = vld [vmem:[#allocation3 + $0x30] sm:$0xff] }
 0x8c6   :  { %1364 = vmatpush1.bf16.msra.mxu1 %v1214_v21  ;;  %1446 = vmatpush1.bf16.msra.mxu0 %v1216_v22  ;;  %v1223_v27 = vld [vmem:[#allocation3 + $0x48] sm:$0xff]  ;;  %v1225_v29 = vld [vmem:[#allocation3 + $0x58] sm:$0xff]  ;;  %v1222_v57 = vld [vmem:[#allocation3 + $0x40] sm:$0xff] }
 0x8c7   :  { %1365 = vmatprep.subr.bf16.mxu1 %v1219_v23  ;;  %1447 = vmatprep.subr.bf16.mxu0 %v1221_v24  ;;  %v1224_v31 = vld [vmem:[#allocation3 + $0x50] sm:$0xff]  ;;  %v1227_v32 = vld [vmem:[#allocation3 + $0x68] sm:$0xff]  ;;  %v1229_v33 = vld [vmem:[#allocation3 + $0x78] sm:$0xff] }
 0x8c8   :  { %v1226_v28 = vld [vmem:[#allocation3 + $0x60] sm:$0xff]  ;;  %v1228_v30 = vld [vmem:[#allocation3 + $0x70] sm:$0xff]  ;;  %v1231_v34 = vld [vmem:[#allocation3 + $0x88] sm:$0xff] }
 0x8c9   :  { %v1233_v35 = vld [vmem:[#allocation3 + $0x98] sm:$0xff]  ;;  %v1230_v36 = vld [vmem:[#allocation3 + $0x80] sm:$0xff]  ;;  %v1232_v41 = vld [vmem:[#allocation3 + $0x90] sm:$0xff] }
 0x8ca   :  { %1366 = vmatpush1.bf16.msra.mxu1 %v1218_v25  ;;  %1448 = vmatpush1.bf16.msra.mxu0 %v1220_v26  ;;  %v1235_v37 = vld [vmem:[#allocation3 + $0xa8] sm:$0xff]  ;;  %v1237_v42 = vld [vmem:[#allocation3 + $0xb8] sm:$0xff]  ;;  %v1234_v43 = vld [vmem:[#allocation3 + $0xa0] sm:$0xff] }
 0x8cb   :  { %1367 = vmatprep.subr.bf16.mxu1 %v1223_v27  ;;  %1449 = vmatprep.subr.bf16.mxu0 %v1225_v29  ;;  %v1236_v38 = vld [vmem:[#allocation3 + $0xb0] sm:$0xff]  ;;  %v1239_v44 = vld [vmem:[#allocation3 + $0xc8] sm:$0xff]  ;;  %v1241_v45 = vld [vmem:[#allocation3 + $0xd8] sm:$0xff] }
 0x8cc   :  { %v1238_v39 = vld [vmem:[#allocation3 + $0xc0] sm:$0xff]  ;;  %v1240_v0 = vld [vmem:[#allocation3 + $0xd0] sm:$0xff]  ;;  %v1243_v46 = vld [vmem:[#allocation3 + $0xe8] sm:$0xff] }
 0x8cd   :  { %v1245_v40 = vld [vmem:[#allocation3 + $0xf8] sm:$0xff]  ;;  %v1242_v47 = vld [vmem:[#allocation3 + $0xe0] sm:$0xff]  ;;  %v1244_v49 = vld [vmem:[#allocation3 + $0xf0] sm:$0xff] }
 0x8ce   :  { %1368 = vmatpush1.bf16.msra.mxu1 %v1222_v57  ;;  %1450 = vmatpush1.bf16.msra.mxu0 %v1224_v31  ;;  %v1247_v52 = vld [vmem:[#allocation3 + $0x108] sm:$0xff]  ;;  %v1249_v53 = vld [vmem:[#allocation3 + $0x118] sm:$0xff]  ;;  %v1246_v54 = vld [vmem:[#allocation3 + $0x100] sm:$0xff] }
 0x8cf   :  { %1369 = vmatprep.subr.bf16.mxu1 %v1227_v32  ;;  %1451 = vmatprep.subr.bf16.mxu0 %v1229_v33  ;;  %v1248_v56 = vld [vmem:[#allocation3 + $0x110] sm:$0xff]  ;;  %v1251_v58 = vld [vmem:[#allocation3 + $0x128] sm:$0xff]  ;;  %v1253_v59 = vld [vmem:[#allocation3 + $0x138] sm:$0xff] }
 0x8d0   :  { %v1250_v60 = vld [vmem:[#allocation3 + $0x120] sm:$0xff]  ;;  %v1252_v62 = vld [vmem:[#allocation3 + $0x130] sm:$0xff]  ;;  %v1255_v55 = vld [vmem:[#allocation3 + $0x148] sm:$0xff] }
 0x8d1   :  { %v1257_v4 = vld [vmem:[#allocation3 + $0x158] sm:$0xff]  ;;  %v1254_v7 = vld [vmem:[#allocation3 + $0x140] sm:$0xff]  ;;  %v1256_v8 = vld [vmem:[#allocation3 + $0x150] sm:$0xff] }
 0x8d2   :  { %1370 = vmatpush1.bf16.msra.mxu1 %v1226_v28  ;;  %1452 = vmatpush1.bf16.msra.mxu0 %v1228_v30  ;;  %v1259_v9 = vld [vmem:[#allocation3 + $0x168] sm:$0xff]  ;;  %v1261_v10 = vld [vmem:[#allocation3 + $0x178] sm:$0xff]  ;;  %v1258_v11 = vld [vmem:[#allocation3 + $0x160] sm:$0xff]  ;;  %v1210_v30 = vpack.c.bf16 %v1202_v63, %v1202_v63 }
 0x8d3   :  { %1371 = vmatprep.subr.bf16.mxu1 %v1231_v34  ;;  %1453 = vmatprep.subr.bf16.mxu0 %v1233_v35  ;;  %v1260_v12 = vld [vmem:[#allocation3 + $0x170] sm:$0xff]  ;;  %v1263_v13 = vld [vmem:[#allocation3 + $0x188] sm:$0xff]  ;;  %v1265_v15 = vld [vmem:[#allocation3 + $0x198] sm:$0xff] }
 0x8d4   :  { %v1262_v19 = vld [vmem:[#allocation3 + $0x180] sm:$0xff]  ;;  %v1264_v1 = vld [vmem:[#allocation3 + $0x190] sm:$0xff]  ;;  %v1267_v20 = vld [vmem:[#allocation3 + $0x1a8] sm:$0xff] }
 0x8d5   :  { %v1269_v21 = vld [vmem:[#allocation3 + $0x1b8] sm:$0xff]  ;;  %v1266_v22 = vld [vmem:[#allocation3 + $0x1a0] sm:$0xff]  ;;  %v1268_v23 = vld [vmem:[#allocation3 + $0x1b0] sm:$0xff] }
 0x8d6   :  { %1372 = vmatpush1.bf16.msra.mxu1 %v1230_v36  ;;  %1454 = vmatpush1.bf16.msra.mxu0 %v1232_v41  ;;  %v1271_v24 = vld [vmem:[#allocation3 + $0x1c8] sm:$0xff]  ;;  %v1273_v25 = vld [vmem:[#allocation3 + $0x1d8] sm:$0xff]  ;;  %v1270_v26 = vld [vmem:[#allocation3 + $0x1c0] sm:$0xff] }
 0x8d7   :  { %1373 = vmatprep.subr.bf16.mxu1 %v1235_v37  ;;  %1455 = vmatprep.subr.bf16.mxu0 %v1237_v42  ;;  %v1272_v27 = vld [vmem:[#allocation3 + $0x1d0] sm:$0xff]  ;;  %v1275_v29 = vld [vmem:[#allocation3 + $0x1e8] sm:$0xff]  ;;  %v1277_v57 = vld [vmem:[#allocation3 + $0x1f8] sm:$0xff]  ;;  %v1213_v37 = vpack.c.bf16 %v1205_v18, %v1205_v18 }
 0x8d8   :  { %v1274_v31 = vld [vmem:[#allocation3 + $0x1e0] sm:$0xff]  ;;  %v1276_v32 = vld [vmem:[#allocation3 + $0x1f0] sm:$0xff]  ;;  %v1279_v33 = vld [vmem:[#allocation3 + $0x208] sm:$0xff] }
 0x8d9   :  { %v1281_v28 = vld [vmem:[#allocation3 + $0x218] sm:$0xff]  ;;  %v1278_v34 = vld [vmem:[#allocation3 + $0x200] sm:$0xff]  ;;  %v1280_v35 = vld [vmem:[#allocation3 + $0x210] sm:$0xff] }
 0x8da   :  { %1374 = vmatpush1.bf16.msra.mxu1 %v1234_v43  ;;  %1456 = vmatpush1.bf16.msra.mxu0 %v1236_v38  ;;  %v1283_v36 = vld [vmem:[#allocation3 + $0x228] sm:$0xff]  ;;  %v1285_v41 = vld [vmem:[#allocation3 + $0x238] sm:$0xff]  ;;  %v1282_v61 = vld [vmem:[#allocation3 + $0x220] sm:$0xff] }
 0x8db   :  { %1375 = vmatprep.subr.bf16.mxu1 %v1239_v44  ;;  %1457 = vmatprep.subr.bf16.mxu0 %v1241_v45  ;;  %v1284_v63 = vld [vmem:[#allocation3 + $0x230] sm:$0xff]  ;;  %v1287_v42 = vld [vmem:[#allocation3 + $0x248] sm:$0xff]  ;;  %v1289_v43 = vld [vmem:[#allocation3 + $0x258] sm:$0xff] }
 0x8dc   :  { %v1286_v38 = vld [vmem:[#allocation3 + $0x240] sm:$0xff]  ;;  %v1288_v16 = vld [vmem:[#allocation3 + $0x250] sm:$0xff]  ;;  %v1291_v44 = vld [vmem:[#allocation3 + $0x268] sm:$0xff] }
 0x8dd   :  { %v1293_v18 = vld [vmem:[#allocation3 + $0x278] sm:$0xff]  ;;  %v1290_v45 = vld [vmem:[#allocation3 + $0x260] sm:$0xff] }
 0x8de   :  { %1376 = vmatpush1.bf16.msra.mxu1 %v1238_v39  ;;  %1458 = vmatpush1.bf16.msra.mxu0 %v1240_v0  ;;  %v1292_v39 = vld [vmem:[#allocation3 + $0x270] sm:$0xff]  ;;  %v1295_v0 = vld [vmem:[#allocation3 + $0x288] sm:$0xff] }
 0x8df   :  { %1377 = vmatprep.subr.bf16.mxu1 %v1243_v46  ;;  %1459 = vmatprep.subr.bf16.mxu0 %v1245_v40  ;;  %v1297_v46 = vld [vmem:[#allocation3 + $0x298] sm:$0xff]  ;;  %v1294_v40 = vld [vmem:[#allocation3 + $0x280] sm:$0xff] }
 0x8e2   :  { %1378 = vmatpush1.bf16.msra.mxu1 %v1242_v47  ;;  %1460 = vmatpush1.bf16.msra.mxu0 %v1244_v49  ;;  %v1296_v47 = vld [vmem:[#allocation3 + $0x290] sm:$0xff]  ;;  %v1299_v49 = vld [vmem:[#allocation3 + $0x2a8] sm:$0xff] }
 0x8e3   :  { %1379 = vmatprep.subr.bf16.mxu1 %v1247_v52  ;;  %1461 = vmatprep.subr.bf16.mxu0 %v1249_v53  ;;  %v1301_v52 = vld [vmem:[#allocation3 + $0x2b8] sm:$0xff]  ;;  %v1298_v53 = vld [vmem:[#allocation3 + $0x2a0] sm:$0xff] }
 0x8e6   :  { %1380 = vmatpush1.bf16.msra.mxu1 %v1246_v54  ;;  %1462 = vmatpush1.bf16.msra.mxu0 %v1248_v56  ;;  %v1300_v54 = vld [vmem:[#allocation3 + $0x2b0] sm:$0xff]  ;;  %v1303_v56 = vld [vmem:[#allocation3 + $0x2c8] sm:$0xff] }
 0x8e7   :  { %1381 = vmatprep.subr.bf16.mxu1 %v1251_v58  ;;  %1463 = vmatprep.subr.bf16.mxu0 %v1253_v59  ;;  %v1305_v58 = vld [vmem:[#allocation3 + $0x2d8] sm:$0xff]  ;;  %v1302_v59 = vld [vmem:[#allocation3 + $0x2c0] sm:$0xff] }
 0x8ea   :  { %1382 = vmatpush1.bf16.msra.mxu1 %v1250_v60  ;;  %1464 = vmatpush1.bf16.msra.mxu0 %v1252_v62  ;;  %v1304_v60 = vld [vmem:[#allocation3 + $0x2d0] sm:$0xff]  ;;  %v1307_v62 = vld [vmem:[#allocation3 + $0x2e8] sm:$0xff] }
 0x8eb   :  { %1383 = vmatprep.subr.bf16.mxu1 %v1255_v55  ;;  %1465 = vmatprep.subr.bf16.mxu0 %v1257_v4  ;;  %v1309_v55 = vld [vmem:[#allocation3 + $0x2f8] sm:$0xff]  ;;  %v1306_v4 = vld [vmem:[#allocation3 + $0x2e0] sm:$0xff] }
 0x8ee   :  { %1384 = vmatpush1.bf16.msra.mxu1 %v1254_v7  ;;  %1466 = vmatpush1.bf16.msra.mxu0 %v1256_v8  ;;  %v1308_v7 = vld [vmem:[#allocation3 + $0x2f0] sm:$0xff]  ;;  %v1311_v8 = vld [vmem:[#allocation3 + $0x308] sm:$0xff] }
 0x8ef   :  { %1385 = vmatprep.subr.bf16.mxu1 %v1259_v9  ;;  %1467 = vmatprep.subr.bf16.mxu0 %v1261_v10  ;;  %v1313_v9 = vld [vmem:[#allocation3 + $0x318] sm:$0xff]  ;;  %v1310_v10 = vld [vmem:[#allocation3 + $0x300] sm:$0xff] }
 0x8f2   :  { %1386 = vmatpush1.bf16.msra.mxu1 %v1258_v11  ;;  %1468 = vmatpush1.bf16.msra.mxu0 %v1260_v12  ;;  %v1312_v11 = vld [vmem:[#allocation3 + $0x310] sm:$0xff]  ;;  %v1315_v12 = vld [vmem:[#allocation3 + $0x328] sm:$0xff] }
 0x8f3   :  { %1387 = vmatprep.subr.bf16.mxu1 %v1263_v13  ;;  %1469 = vmatprep.subr.bf16.mxu0 %v1265_v15  ;;  %v1317_v13 = vld [vmem:[#allocation3 + $0x338] sm:$0xff]  ;;  %v1314_v15 = vld [vmem:[#allocation3 + $0x320] sm:$0xff] }
 0x8f6   :  { %1388 = vmatpush1.bf16.msra.mxu1 %v1262_v19  ;;  %1470 = vmatpush1.bf16.msra.mxu0 %v1264_v1  ;;  %v1316_v19 = vld [vmem:[#allocation3 + $0x330] sm:$0xff]  ;;  %v1319_v1 = vld [vmem:[#allocation3 + $0x348] sm:$0xff] }
 0x8f7   :  { %1389 = vmatprep.subr.bf16.mxu1 %v1267_v20  ;;  %1471 = vmatprep.subr.bf16.mxu0 %v1269_v21  ;;  %v1321_v20 = vld [vmem:[#allocation3 + $0x358] sm:$0xff]  ;;  %v1318_v21 = vld [vmem:[#allocation3 + $0x340] sm:$0xff] }
 0x8fa   :  { %1390 = vmatpush1.bf16.msra.mxu1 %v1266_v22  ;;  %1472 = vmatpush1.bf16.msra.mxu0 %v1268_v23  ;;  %v1320_v22 = vld [vmem:[#allocation3 + $0x350] sm:$0xff]  ;;  %v1323_v23 = vld [vmem:[#allocation3 + $0x368] sm:$0xff] }
 0x8fb   :  { %1391 = vmatprep.subr.bf16.mxu1 %v1271_v24  ;;  %1473 = vmatprep.subr.bf16.mxu0 %v1273_v25  ;;  %v1325_v24 = vld [vmem:[#allocation3 + $0x378] sm:$0xff]  ;;  %v1322_v25 = vld [vmem:[#allocation3 + $0x360] sm:$0xff] }
 0x8fe   :  { %1392 = vmatpush1.bf16.msra.mxu1 %v1270_v26  ;;  %1474 = vmatpush1.bf16.msra.mxu0 %v1272_v27  ;;  %v1324_v26 = vld [vmem:[#allocation3 + $0x370] sm:$0xff]  ;;  %v1327_v27 = vld [vmem:[#allocation3 + $0x388] sm:$0xff] }
 0x8ff   :  { %1393 = vmatprep.subr.bf16.mxu1 %v1275_v29  ;;  %1475 = vmatprep.subr.bf16.mxu0 %v1277_v57  ;;  %v1329_v29 = vld [vmem:[#allocation3 + $0x398] sm:$0xff]  ;;  %v1326_v57 = vld [vmem:[#allocation3 + $0x380] sm:$0xff] }
 0x902   :  { %1394 = vmatpush1.bf16.msra.mxu1 %v1274_v31  ;;  %1476 = vmatpush1.bf16.msra.mxu0 %v1276_v32  ;;  %v1328_v31 = vld [vmem:[#allocation3 + $0x390] sm:$0xff]  ;;  %v1331_v32 = vld [vmem:[#allocation3 + $0x3a8] sm:$0xff] }
 0x903   :  { %1404 = vmatprep.subr.bf16.mxu1 %v1279_v33  ;;  %1486 = vmatprep.subr.bf16.mxu0 %v1281_v28  ;;  %v1333_v33 = vld [vmem:[#allocation3 + $0x3b8] sm:$0xff]  ;;  %v1330_v28 = vld [vmem:[#allocation3 + $0x3a0] sm:$0xff] }
 0x905   :  { %1396 = vmatmul.mubr.bf16.vlgmr.msra.gmra.mrb[24].mxu1 %v1210_v30  ;;  %1478 = vmatmul.mubr.bf16.vlgmr.msra.gmra.mrb[28].mxu0 %v1210_v30  ;;  %v1332_v30 = vld [vmem:[#allocation3 + $0x3b0] sm:$0xff] }
 0x906   :  { %1405 = vmatpush1.bf16.msra.mxu1 %v1278_v34  ;;  %1487 = vmatpush1.bf16.msra.mxu0 %v1280_v35  ;;  %v1335_v34 = vld [vmem:[#allocation3 + $0x3c8] sm:$0xff]  ;;  %v1337_v35 = vld [vmem:[#allocation3 + $0x3d8] sm:$0xff] }
 0x907   :  { %1406 = vmatprep.subr.bf16.mxu1 %v1283_v36  ;;  %1488 = vmatprep.subr.bf16.mxu0 %v1285_v41  ;;  %v1334_v36 = vld [vmem:[#allocation3 + $0x3c0] sm:$0xff]  ;;  %v1336_v41 = vld [vmem:[#allocation3 + $0x3d0] sm:$0xff] }
 0x908   :  { %1436 = vmatprep.mubr.bf16.mxu1 %v1213_v37  ;;  %1518 = vmatprep.mubr.bf16.mxu0 %v1213_v37  ;;  %v1339_v37 = vld [vmem:[#allocation3 + $0x3e8] sm:$0xff] }
 0x90a   :  { %1407 = vmatpush1.bf16.msra.mxu1 %v1282_v61  ;;  %1489 = vmatpush1.bf16.msra.mxu0 %v1284_v63  ;;  %v1341_v61 = vld [vmem:[#allocation3 + $0x3f8] sm:$0xff]  ;;  %v1338_v63 = vld [vmem:[#allocation3 + $0x3e0] sm:$0xff] }
 0x90b   :  { %1408 = vmatprep.subr.bf16.mxu1 %v1287_v42  ;;  %1490 = vmatprep.subr.bf16.mxu0 %v1289_v43  ;;  %v1340_v42 = vld [vmem:[#allocation3 + $0x3f0] sm:$0xff]  ;;  %v1212_v43 = vpack.c.bf16 %v1204_v17, %v1204_v17 }
 0x90e   :  { %1409 = vmatpush1.bf16.msra.mxu1 %v1286_v38  ;;  %1491 = vmatpush1.bf16.msra.mxu0 %v1288_v16  ;;  %v1346_v38 = vrot.slane %v2352_v2, %v2530_v50  ;;  %v1354_v16 = vrot.slane %v2352_v2, %v2541_v5 }
 0x90f   :  { %1410 = vmatprep.subr.bf16.mxu1 %v1291_v44  ;;  %1492 = vmatprep.subr.bf16.mxu0 %v1293_v18  ;;  %v1531_v44 = vld [vmem:[%s2600_s5] sm:$0xf]  ;;  %v1350_v18 = vrot.slane %v2352_v2, %v2532_v51  ;;  %s2228_s5 = smov [#allocation13]  }
 0x910   :  { %s1597_s11 = sshll.u32 %s2228_s5, 4  ;;  %s1598_s11 = int_to_ptr.vmem [resolvable:$true] %s1597_s11 }
 0x911   :  { %s2175_s12 = scalar_lea.vmem %s1598_s11, 32  ;;  %p2180_p13 = scmp.lt.s32.totalorder %s1598_s11, %s1598_s11 }
 0x912   :  { %1411 = vmatpush1.bf16.msra.mxu1 %v1290_v45  ;;  %1493 = vmatpush1.bf16.msra.mxu0 %v1292_v39  ;;  %p2176_p12 = scmp.ne.s32.totalorder %s1598_s11, %s2175_s12  ;;  %p2181_p0 = scmp.lt.s32.totalorder %s2175_s12, %s2175_s12 }
 0x913   :  { %1412 = vmatprep.subr.bf16.mxu1 %v1295_v0  ;;  %1494 = vmatprep.subr.bf16.mxu0 %v1297_v46  ;;  %v1536_v0 = vrot.slane %v1531_v44, %v2530_v50 }
 0x914   :  { %p2182_p1 = por %p2181_p0, %p2180_p13 }
 0x916   :  { %1413 = vmatpush1.bf16.msra.mxu1 %v1294_v40  ;;  %1495 = vmatpush1.bf16.msra.mxu0 %v1296_v47  ;;  %p2183_p2 = pnand %p2182_p1, %p2176_p12 }
 0x917   :  { %1414 = vmatprep.subr.bf16.mxu1 %v1299_v49  ;;  %1496 = vmatprep.subr.bf16.mxu0 %v1301_v52  ;;  %v1544_v49 = vrot.slane %v1531_v44, %v2541_v5 }
 0x91a   :  { %1415 = vmatpush1.bf16.msra.mxu1 %v1298_v53  ;;  %1497 = vmatpush1.bf16.msra.mxu0 %v1300_v54  ;;  %v1540_v53 = vrot.slane %v1531_v44, %v2532_v51 }
 0x91b   :  { %1416 = vmatprep.subr.bf16.mxu1 %v1303_v56  ;;  %1498 = vmatprep.subr.bf16.mxu0 %v1305_v58 }
 0x91e   :  { %1417 = vmatpush1.bf16.msra.mxu1 %v1302_v59  ;;  %1499 = vmatpush1.bf16.msra.mxu0 %v1304_v60 }
 0x91f   :  { %1418 = vmatprep.subr.bf16.mxu1 %v1307_v62  ;;  %1500 = vmatprep.subr.bf16.mxu0 %v1309_v55 }
 0x922   :  { %1419 = vmatpush1.bf16.msra.mxu1 %v1306_v4  ;;  %1501 = vmatpush1.bf16.msra.mxu0 %v1308_v7  ;;  %v1548_v7 = vrot.slane %v1531_v44, %v2543_v6 }
 0x923   :  { %1420 = vmatprep.subr.bf16.mxu1 %v1311_v8  ;;  %1502 = vmatprep.subr.bf16.mxu0 %v1313_v9 }
 0x926   :  { %1421 = vmatpush1.bf16.msra.mxu1 %v1310_v10  ;;  %1503 = vmatpush1.bf16.msra.mxu0 %v1312_v11 }
 0x927   :  { %1422 = vmatprep.subr.bf16.mxu1 %v1315_v12  ;;  %1504 = vmatprep.subr.bf16.mxu0 %v1317_v13 }
 0x92a   :  { %1423 = vmatpush1.bf16.msra.mxu1 %v1314_v15  ;;  %1505 = vmatpush1.bf16.msra.mxu0 %v1316_v19 }
 0x92b   :  { %1424 = vmatprep.subr.bf16.mxu1 %v1319_v1  ;;  %1506 = vmatprep.subr.bf16.mxu0 %v1321_v20 }
 0x92e   :  { %1425 = vmatpush1.bf16.msra.mxu1 %v1318_v21  ;;  %1507 = vmatpush1.bf16.msra.mxu0 %v1320_v22 }
 0x92f   :  { %1426 = vmatprep.subr.bf16.mxu1 %v1323_v23  ;;  %1508 = vmatprep.subr.bf16.mxu0 %v1325_v24 }
 0x932   :  { %1427 = vmatpush1.bf16.msra.mxu1 %v1322_v25  ;;  %1509 = vmatpush1.bf16.msra.mxu0 %v1324_v26  ;;  %v1575_v26 = vand.u32 127, %v1178_v48 }
 0x933   :  { %1428 = vmatprep.subr.bf16.mxu1 %v1327_v27  ;;  %1510 = vmatprep.subr.bf16.mxu0 %v1329_v29 }
 0x934   :  { %vm1576_vm6 = vcmp.eq.s32.totalorder %v1575_v26, 1 }
 0x936   :  { %1429 = vmatpush1.bf16.msra.mxu1 %v1326_v57  ;;  %1511 = vmatpush1.bf16.msra.mxu0 %v1328_v31 }
 0x937   :  { %1430 = vmatprep.subr.bf16.mxu1 %v1331_v32  ;;  %1512 = vmatprep.subr.bf16.mxu0 %v1333_v33 }
 0x93a   :  { %1431 = vmatpush1.bf16.msra.mxu1 %v1330_v28  ;;  %1513 = vmatpush1.bf16.msra.mxu0 %v1332_v30 }
 0x93b   :  { %1432 = vmatprep.subr.bf16.mxu1 %v1335_v34  ;;  %1514 = vmatprep.subr.bf16.mxu0 %v1337_v35 }
 0x93e   :  { %1433 = vmatpush1.bf16.msra.mxu1 %v1334_v36  ;;  %1515 = vmatpush1.bf16.msra.mxu0 %v1336_v41 }
 0x93f   :  { %1434 = vmatprep.subr.bf16.mxu1 %v1339_v37  ;;  %1516 = vmatprep.subr.bf16.mxu0 %v1341_v61 }
 0x942   :  { %1435 = vmatpush1.bf16.msra.mxu1 %v1338_v63  ;;  %1517 = vmatpush1.bf16.msra.mxu0 %v1340_v42 }
 0x945   :  { %1437 = vmatmul.mubr.bf16.vlgmr.msra.gmra.mrb[24].mxu1 %v1212_v43  ;;  %1519 = vmatmul.mubr.bf16.vlgmr.msra.gmra.mrb[28].mxu0 %v1212_v43 }
 0xa18   :  { %v1438_v17 = vpop.f32.mrb[24].mxu1  ;;  %v1520_v45 = vpop.f32.mrb[28].mxu0 }
 0xa19   :  { %v1932_v39 = vadd.f32 %v1438_v17, %v1346_v38  ;;  %v1934_v46 = vadd.f32 %v1520_v45, %v1354_v16  ;;  %v1440_v40 = vpop.f32.mrb[25].mxu1  ;;  %v1522_v47 = vpop.f32.mrb[29].mxu0 }
 0xa1a   :  { %v1933_v52 = vadd.f32 %v1440_v40, %v1350_v18  ;;  %v1935_v54 = vadd.f32 %v1522_v47, %v1358_v14  ;;  %v1442_v56 = vpop.f32.mrb[26].mxu1  ;;  %v1524_v58 = vpop.f32.mrb[30].mxu0 }
 0xa1b   :  { %v1527_v59 = vmax.f32 %v1932_v39, 0.0  ;;  %v1529_v60 = vmax.f32 %v1934_v46, 0.0  ;;  %v1443_v62 = vpop.f32.mrb[27].mxu1  ;;  %v1525_v2 = vpop.f32.mrb[31].mxu0 }
 0xa1c   :  { %v1528_v55 = vmax.f32 %v1933_v52, 0.0  ;;  %v1530_v4 = vmax.f32 %v1935_v54, 0.0 }
 0xa1d   :  { %v1553_v50 = vmul.f32 %v1536_v0, %v1527_v59  ;;  %v1555_v8 = vmul.f32 %v1544_v49, %v1529_v60 }
 0xa1e   :  { %v1554_v9 = vmul.f32 %v1540_v53, %v1528_v55  ;;  %v1556_v5 = vmul.f32 %v1548_v7, %v1530_v4 }
 0xa1f   :  { %v1558_v10 = vsel %vm1557_vm5, %v1553_v50, 0.0  ;;  %v1561_v51 = vsel %vm1557_vm5, %v1555_v8, 0.0 }
 0xa20   :  { %v1559_v11 = vsel %vm1557_vm5, %v1554_v9, 0.0  ;;  %v1563_v15 = vsel %vm1557_vm5, %v1556_v5, 0.0 }
 0xa21   :  { %v1560_v12 = vadd.f32 %v1559_v11, %v1558_v10 }
 0xa23   :  { %v1562_v13 = vadd.f32 %v1561_v51, %v1560_v12 }
 0xa25   :  { %v1564_v19 = vadd.f32 %v1563_v15, %v1562_v13 }
 0xa27   :  { %1565 = vadd.xlane.f32.xlu0 %v1564_v19 }
 0xab4   :  { %v1566_v1 = vpop.xlane.xlu0 %1565 }
 0xab5   :  { %v1567_v20 = vadd.f32 %v1566_v1, %v2354_v3 }
 0xab7   :  { %v1568_v21 = vsub.f32 0.0, %v1567_v20 }
 0xab9   :  { %v1569_v22 = vmul.f32 1.442695, %v1568_v21 }
 0xabb   :  { %2061 = vpow2.f32 %v1569_v22 }
 0xac5   :  { %v2062_v6 = vpop.eup %2061 }
 0xac6   :  { %v1571_v23 = vadd.f32 1.0, %v2062_v6 }
 0xac8   :  { %2063 = vrcp.f32 %v1571_v23 }
 0xad2   :  { %v2064_v24 = vpop.eup %2063 }
 0xad3   :  { %1580 = vperm.xlu0 %2059, %v2064_v24   ;;  %v1577_v25 = vsub.f32 1.0, %v2064_v24 }
 0xad5   :  { %1585 = vperm.xlu1 %2060, %v1577_v25  }
 0xb52   :  { %v1581_v27 = vpop.permute.xlu0 %1580 }
 0xb54   :  { %v1586_v29 = vpop.permute.xlu1 %1585 }
 0xb55   :  { %v1588_v3 = vsel %vm1576_vm6, %v1581_v27, %v1586_v29 }
 0xb56   :  { %1590 = vst.msk [vmem:[#allocation13] sm:$0x3] %vm1589_vm7, %v1588_v3 }
 0xb57   :  { %2186 = shalt.err (!%p2183_p2)
}
 0xb58   :  { %s2187_s14 = scalar_lea.hbm %s2603_s8, 32 }
 0xb59   :  { %p2188_p3 = scmp.ne.s32.totalorder %s2603_s8, %s2187_s14  ;;  %p2191_p4 = scmp.lt.u32.totalorder %s2187_s14, %s2603_s8 }
 0xb5b   :  { %p2193_p5 = pnand %p2191_p4, %p2188_p3 }
 0xb5d   :  { %2196 = shalt.err (!%p2193_p5)
}
 0xb5e   :  { %1600 = dma.vmem_to_hbm [thread:$0]  %s1598_s11, 32, %s2603_s8, [#allocation7]  }
 0xb5f   :  { %2207 = dma.done.wait [#allocation7], 32  }
 0xb60   :  { %2208 = vsyncadd [#allocation7], 4294967264 }
 0xb61   :  { %1604 = vsyncpa [#allocation6], 1 }
 0xb62   :  { %1605 = vsyncpa [#allocation9], 1 }
 0xb63   :  { %1606 = vsyncpa [#allocation12], 1 }
 0xb64   :  { %1607 = vsyncpa [#allocation7], 1 }
 0xb65   :  { %1608 = vsyncmov [#allocation4] }
 0xb68   :  { %s1609_s0 = vpop.sfrf %1608 }
 0xb69   :  { %p1691_p6 = scmp.ne.s32.totalorder %s1609_s0, 0 }
 0xb6b   :  { %1613 = shalt.err (%p1691_p6)  }
 0xb6c   :  { %1615 = vsyncmov [#allocation4 + $0x1] }
 0xb6f   :  { %s1616_s20 = vpop.sfrf %1615 }
 0xb70   :  { %p1692_p7 = scmp.ne.s32.totalorder %s1616_s20, 0 }
 0xb72   :  { %1620 = shalt.err (%p1692_p7)  }

</bundles_post_ra>
